<compile_context>
chip_gen: v5e
topology: v5e:2x2
jax: 0.10.0
libtpu: 0.0.40
codegen_flags: <defaults>
</compile_context>

<pallas_src>
import functools
import math

import jax
import jax.numpy as jnp
from jax.experimental import pallas as pl
from jax.experimental.pallas import tpu as pltpu

_VMEM_LIMIT = 48 * 1024 * 1024  # explicit scoped-VMEM budget (fits v7x 64 MiB with headroom)


def _round_up(x, m):
    return ((x + m - 1) // m) * m


# ----------------------------------------------------------------------------
# Kernel A: fused 1x1 heads
#   shared ReLU(x) -> [maskg | strutureg] matmul -> ReLU(struct) -> coord head
#   Output is one lane-dense packed block:
#     col 0            : raw (pre-sigmoid) mask logits
#     cols 1..Sd       : ReLU'd structure map
#     cols 1+Sd..2+Sd  : sigmoid coord prediction
#     remaining cols   : zero padding up to a multiple of 128 lanes
# ----------------------------------------------------------------------------
def _fused_heads_kernel(x_ref, w1_ref, b1_ref, w2_ref, b2_ref, o_ref,
                        *, n_struct_end, n_valid):
    # shared ReLU on the input features (maskg and strutureg both start with ReLU)
    xb = jnp.maximum(x_ref[...], 0.0).astype(jnp.bfloat16)           # (tm, C)

    # maskg + strutureg as one lane-dense matmul (bf16 operands, f32 accum)
    y = jnp.dot(xb, w1_ref[...], preferred_element_type=jnp.float32)  # (tm, out_pad)
    y = y + b1_ref[...]
    y_relu = jnp.maximum(y, 0.0)

    # coord head chained in-kernel: sigmoid(struct @ Wc + bc).  Wc is embedded in a
    # zero-padded (out_pad, out_pad) matrix so no lane slicing is needed; only the
    # structure columns of y_relu contribute.
    coord = jax.nn.sigmoid(
        jnp.dot(y_relu.astype(jnp.bfloat16), w2_ref[...],
                preferred_element_type=jnp.float32) + b2_ref[...])     # (tm, out_pad)

    col = jax.lax.broadcasted_iota(jnp.int32, y.shape, 1)
    out = jnp.where(col == 0, y,                       # raw mask logits
          jnp.where(col < n_struct_end, y_relu,        # ReLU'd structure map
          jnp.where(col < n_valid, coord, 0.0)))       # sigmoid coord pred / zero pad
    o_ref[...] = out


def _build_fused_weights(params, feature_dim, structure_dim, out_pad):
    sd = structure_dim
    w_all = jnp.zeros((feature_dim, out_pad), jnp.float32)
    w_all = w_all.at[:, 0:1].set(params["maskg_w"])
    w_all = w_all.at[:, 1:1 + sd].set(params["structg_w"])
    b_all = jnp.zeros((out_pad,), jnp.float32)
    b_all = b_all.at[0].set(params["maskg_b"][0])
    b_all = b_all.at[1:1 + sd].set(params["structg_b"])
    wc_all = jnp.zeros((out_pad, out_pad), jnp.float32)
    wc_all = wc_all.at[1:1 + sd, 1 + sd:3 + sd].set(params["coord_w"])
    bc_all = jnp.zeros((out_pad,), jnp.float32)
    bc_all = bc_all.at[1 + sd:3 + sd].set(params["coord_b"])
    return (w_all.astype(jnp.bfloat16), b_all.reshape(1, out_pad),
            wc_all.astype(jnp.bfloat16), bc_all.reshape(1, out_pad))


def fused_heads(x2d, params, *, structure_dim):
    """x2d: (R, C) pixel rows (NHWC flattened).  Returns (R, 3+structure_dim)
    packed [mask(1) | struct(structure_dim) | coord(2)]."""
    R, C = x2d.shape
    sd = structure_dim
    n_valid = 3 + sd
    out_pad = _round_up(n_valid, 128)          # lane-dense output width

    # Row tiling: up to 512 rows per grid step (measured ~85% HBM roofline);
    # pad rows instead of falling back to one giant untiled block.
    tm = min(512, _round_up(R, 8))
    r_pad = _round_up(R, tm)
    if r_pad != R:
        x2d = jnp.pad(x2d, ((0, r_pad - R), (0, 0)))

    w_all, b_all, wc_all, bc_all = _build_fused_weights(params, C, sd, out_pad)

    kern = functools.partial(_fused_heads_kernel,
                             n_struct_end=1 + sd, n_valid=n_valid)
    out = pl.pallas_call(
        kern,
        out_shape=jax.ShapeDtypeStruct((r_pad, out_pad), jnp.float32),
        grid_spec=pltpu.PrefetchScalarGridSpec(
            num_scalar_prefetch=0,
            grid=(r_pad // tm,),
            in_specs=[pl.BlockSpec((tm, C), lambda i: (i, 0)),
                      pl.BlockSpec((C, out_pad), lambda i: (0, 0)),
                      pl.BlockSpec((1, out_pad), lambda i: (0, 0)),
                      pl.BlockSpec((out_pad, out_pad), lambda i: (0, 0)),
                      pl.BlockSpec((1, out_pad), lambda i: (0, 0))],
            out_specs=pl.BlockSpec((tm, out_pad), lambda i: (i, 0)),
        ),
        compiler_params=pltpu.CompilerParams(
            dimension_semantics=("parallel",),
            vmem_limit_bytes=_VMEM_LIMIT),
    )(x2d, w_all, b_all, wc_all, bc_all)
    return out[:R, :n_valid]


# ----------------------------------------------------------------------------
# Kernel B: object-extent correlation (OEL pseudo-mask) + mask-MSE partial sum.
#   One grid step per positive group (G = num_positive + 1 images resident):
#     extent_i(hw) = (1/P) * sum_{j != i} max_{hw'} <f_i(hw), f_j(hw')>
#   normalised to [0,1] per image by its max; epilogue emits
#   sum((sigmoid(mask) - extent)^2) over the group.
# ----------------------------------------------------------------------------
def _extent_kernel(f_ref, m_ref, ext_ref, loss_ref, *, num_positive, hw):
    G = num_positive + 1
    HW = hw
    a = f_ref[0].astype(jnp.bfloat16)                       # (G*HW, C)

    rows = []
    for i in range(G):                                      # static, G is small
        fi = a[i * HW:(i + 1) * HW, :]                      # (HW, C)
        # s[r, q] = <f(group row r), f_i(q)>  -> (G*HW, HW), bf16 MXU, f32 accum
        s = jax.lax.dot_general(a, fi, (((1,), (1,)), ((), ())),
                                preferred_element_type=jnp.float32)
        acc = jnp.zeros((1, HW), jnp.float32)
        for j in range(G):
            if j == i:
                continue
            acc = acc + jnp.max(s[j * HW:(j + 1) * HW, :], axis=0, keepdims=True)
        ext_i = acc * (1.0 / float(num_positive))
        inv = pl.reciprocal(jnp.max(ext_i, axis=-1, keepdims=True) + 1e-12,
                            approx=True)
        rows.append(ext_i * inv)

    ext = jnp.concatenate(rows, axis=0)                     # (G, HW)
    ext_ref[0] = ext

    # OEL (mask) loss partial sum folded into the epilogue.
    d = jax.nn.sigmoid(m_ref[0].astype(jnp.float32)) - ext
    loss_ref[...] = jnp.sum(d * d).reshape(1, 1, 1)


def calc_rela_pallas(features_flat, mask_flat, num_positive):
    """features_flat: (N, HW, C) raw features, mask_flat: (N, HW) pre-sigmoid mask."""
    N, HW, C = features_flat.shape
    G = num_positive + 1
    assert N % G == 0, "batch must be a multiple of (num_positive + 1)"
    NG = N // G

    feat_group = features_flat.reshape(NG, G * HW, C)
    mask_group = mask_flat.reshape(NG, G, HW)

    kern = functools.partial(_extent_kernel, num_positive=num_positive, hw=HW)
    extents, sse = pl.pallas_call(
        kern,
        out_shape=(jax.ShapeDtypeStruct((NG, G, HW), jnp.float32),
                   jax.ShapeDtypeStruct((NG, 1, 1), jnp.float32)),
        grid_spec=pltpu.PrefetchScalarGridSpec(
            num_scalar_prefetch=0,
            grid=(NG,),
            in_specs=[pl.BlockSpec((1, G * HW, C), lambda g: (g, 0, 0)),
                      pl.BlockSpec((1, G, HW), lambda g: (g, 0, 0))],
            out_specs=[pl.BlockSpec((1, G, HW), lambda g: (g, 0, 0)),
                       pl.BlockSpec((1, 1, 1), lambda g: (g, 0, 0))],
        ),
        compiler_params=pltpu.CompilerParams(
            dimension_semantics=("parallel",),     # groups are independent (v7x 2 TCs)
            vmem_limit_bytes=_VMEM_LIMIT),
    )(feat_group, mask_group)

    mask_loss = jnp.sum(sse) / float(N * HW)
    return mask_loss, extents.reshape(N, HW)


# ----------------------------------------------------------------------------
# CoordPredictor loss (reconstructed from LIO RelativeCoordPredictor).
# Threshold / argmax anchor / polar targets + MSE stay in plain jnp.
# ----------------------------------------------------------------------------
def coord_loss_fn(structure_flat, coord_pred, mask_flat, *, size):
    """structure_flat: (N, HW, Cs), coord_pred: (N, HW, 2), mask_flat: (N, HW)."""
    N, HW, _ = structure_flat.shape
    W = size

    thr = jnp.mean(mask_flat, axis=1, keepdims=True)
    bin_mask = (mask_flat > thr).astype(jnp.float32)                     # (N, HW)

    masked_x = structure_flat * bin_mask[..., None]
    score = jnp.mean(masked_x, axis=-1)                                  # (N, HW)
    anchor_idx = jnp.argmax(score, axis=-1)                              # (N,)

    idx = jnp.arange(HW)
    label = jnp.stack([idx // W, idx % W], axis=-1).astype(jnp.float32)  # (HW, 2)
    anchor = label[anchor_idx]                                           # (N, 2)
    rel = (label[None, :, :] - anchor[:, None, :]) / float(size)         # (N, HW, 2)
    dist = jnp.sqrt(jnp.sum(rel ** 2, axis=-1))                          # (N, HW)
    angle = (jnp.arctan2(rel[..., 1], rel[..., 0]) / jnp.pi + 1.0) / 2.0
    target = jnp.stack([dist, angle], axis=-1) * bin_mask[..., None]     # (N, HW, 2)

    pred = coord_pred * bin_mask[..., None]
    return jnp.mean((pred - target) ** 2)


# ----------------------------------------------------------------------------
# SCLModule forward
# ----------------------------------------------------------------------------
def scl_forward(feature_nchw, params, *, structure_dim, avg, num_positive, M):
    if avg:
        n, c, h, w = feature_nchw.shape
        feature_nchw = feature_nchw.reshape(n, c, h // 2, 2, w // 2, 2).mean(axis=(3, 5))

    N, C, H, W = feature_nchw.shape
    HW = H * W
    x_nhwc = jnp.transpose(feature_nchw, (0, 2, 3, 1))
    x2d = x_nhwc.reshape(N * HW, C)

    # One fused kernel for maskg, strutureg and the coord head.
    packed = fused_heads(x2d, params, structure_dim=structure_dim)   # (N*HW, 3+Sd)
    mask_flat = packed[:, 0].reshape(N, HW)
    struct_flat = packed[:, 1:1 + structure_dim].reshape(N, HW, structure_dim)
    coord_pred = packed[:, 1 + structure_dim:3 + structure_dim].reshape(N, HW, 2)

    # mask_loss, object_extents = calc_rela(feature, mask, num_positive)
    feat_flat = x2d.reshape(N, HW, C)
    mask_loss, extents_flat = calc_rela_pallas(feat_flat, mask_flat, num_positive)

    mask = mask_flat.reshape(N, H, W)
    object_extents = extents_flat.reshape(N, H, W)

    coord_mask = extents_flat if M else mask_flat
    coord_loss = coord_loss_fn(struct_flat, coord_pred, coord_mask, size=H)

    return mask, object_extents, coord_loss, mask_loss


def init_params(key, feature_dim, structure_dim):
    ks = jax.random.split(key, 6)

    def uni(k, shape, fan_in):
        bound = 1.0 / math.sqrt(fan_in)
        return jax.random.uniform(k, shape, jnp.float32, -bound, bound)

    return {
        "maskg_w":   uni(ks[0], (feature_dim, 1), feature_dim),
        "maskg_b":   uni(ks[1], (1,), feature_dim),
        "structg_w": uni(ks[2], (feature_dim, structure_dim), feature_dim),
        "structg_b": uni(ks[3], (structure_dim,), feature_dim),
        "coord_w":   uni(ks[4], (structure_dim, 2), structure_dim),
        "coord_b":   uni(ks[5], (2,), structure_dim),
    }


if __name__ == "__main__":
    key = jax.random.PRNGKey(0)
    kx, kp = jax.random.split(key)

    size = 8            # feature map H = W
    feature_dim = 16
    structure_dim = 8
    num_positive = 1    # group size = 2
    N = 4               # batch, multiple of (num_positive + 1)

    feature = jax.random.normal(kx, (N, feature_dim, size, size), jnp.float32)
    params = init_params(kp, feature_dim, structure_dim)

    fwd = jax.jit(functools.partial(
        scl_forward, structure_dim=structure_dim, avg=False,
        num_positive=num_positive, M=True))

    mask, object_extents, coord_loss, mask_loss = fwd(feature, params)
    jax.block_until_ready((mask, object_extents, coord_loss, mask_loss))

    assert mask.shape == (N, size, size)
    assert object_extents.shape == (N, size, size)
    assert coord_loss.shape == () and mask_loss.shape == ()
    assert bool(jnp.isfinite(coord_loss)) and bool(jnp.isfinite(mask_loss))
    print("KERNEL_OK")
</pallas_src>

<mosaic_0001>
module attributes {stable_mosaic.version = 11 : i64} {
  func.func @_fused_heads_kernel(%arg0: i32, %arg1: memref<256x16xf32, #tpu.memory_space<vmem>>, %arg2: memref<16x128xbf16, #tpu.memory_space<vmem>>, %arg3: memref<1x128xf32, #tpu.memory_space<vmem>>, %arg4: memref<128x128xbf16, #tpu.memory_space<vmem>>, %arg5: memref<1x128xf32, #tpu.memory_space<vmem>>, %arg6: memref<256x128xf32, #tpu.memory_space<vmem>>) attributes {dimension_semantics = [#tpu.dimension_semantics<parallel>], iteration_bounds = array<i64: 1>, scalar_prefetch = 0 : i64, scratch_operands = 0 : i64, tpu.core_type = #tpu.core_type<tc>, window_params = [{transform_indices = @transform_0, window_bounds = array<i64: 256, 16>}, {pipeline_mode = #tpu.pipeline_mode<synchronous>, transform_indices = @transform_1, window_bounds = array<i64: 16, 128>}, {pipeline_mode = #tpu.pipeline_mode<synchronous>, transform_indices = @transform_2, window_bounds = array<i64: 1, 128>}, {pipeline_mode = #tpu.pipeline_mode<synchronous>, transform_indices = @transform_3, window_bounds = array<i64: 128, 128>}, {pipeline_mode = #tpu.pipeline_mode<synchronous>, transform_indices = @transform_4, window_bounds = array<i64: 1, 128>}, {transform_indices = @transform_5, window_bounds = array<i64: 256, 128>}]} {
    %c0 = arith.constant 0 : index
    %c0_0 = arith.constant 0 : index
    %0 = vector.load %arg1[%c0, %c0_0] : memref<256x16xf32, #tpu.memory_space<vmem>>, vector<256x16xf32>
    %cst = arith.constant 0.000000e+00 : f32
    %1 = vector.broadcast %cst : f32 to vector<256x16xf32>
    %2 = arith.maximumf %0, %1 : vector<256x16xf32>
    %3 = arith.truncf %2 : vector<256x16xf32> to vector<256x16xbf16>
    %c0_1 = arith.constant 0 : index
    %c0_2 = arith.constant 0 : index
    %4 = vector.load %arg2[%c0_1, %c0_2] : memref<16x128xbf16, #tpu.memory_space<vmem>>, vector<16x128xbf16>
    %cst_3 = arith.constant dense<0.000000e+00> : vector<256x128xf32>
    %5 = tpu.matmul %3, %4, %cst_3 {dimension_numbers = #tpu.dot_dimension_numbers<[1], [0], [0], [1], [0, 0, 1, 1], [], []>} : vector<256x16xbf16>, vector<16x128xbf16>, vector<256x128xf32> -> vector<256x128xf32>
    %c0_4 = arith.constant 0 : index
    %c0_5 = arith.constant 0 : index
    %6 = vector.load %arg3[%c0_4, %c0_5] : memref<1x128xf32, #tpu.memory_space<vmem>>, vector<1x128xf32>
    %7 = vector.broadcast %6 : vector<1x128xf32> to vector<256x128xf32>
    %8 = arith.addf %5, %7 : vector<256x128xf32>
    %cst_6 = arith.constant 0.000000e+00 : f32
    %9 = vector.broadcast %cst_6 : f32 to vector<256x128xf32>
    %10 = arith.maximumf %8, %9 : vector<256x128xf32>
    %11 = arith.truncf %10 : vector<256x128xf32> to vector<256x128xbf16>
    %c0_7 = arith.constant 0 : index
    %c0_8 = arith.constant 0 : index
    %12 = vector.load %arg4[%c0_7, %c0_8] : memref<128x128xbf16, #tpu.memory_space<vmem>>, vector<128x128xbf16>
    %cst_9 = arith.constant dense<0.000000e+00> : vector<256x128xf32>
    %13 = tpu.matmul %11, %12, %cst_9 {dimension_numbers = #tpu.dot_dimension_numbers<[1], [0], [0], [1], [0, 0, 1, 1], [], []>} : vector<256x128xbf16>, vector<128x128xbf16>, vector<256x128xf32> -> vector<256x128xf32>
    %c0_10 = arith.constant 0 : index
    %c0_11 = arith.constant 0 : index
    %14 = vector.load %arg5[%c0_10, %c0_11] : memref<1x128xf32, #tpu.memory_space<vmem>>, vector<1x128xf32>
    %15 = vector.broadcast %14 : vector<1x128xf32> to vector<256x128xf32>
    %16 = arith.addf %13, %15 : vector<256x128xf32>
    %17 = arith.negf %16 : vector<256x128xf32>
    %18 = math.exp %17 : vector<256x128xf32>
    %cst_12 = arith.constant 1.000000e+00 : f32
    %19 = vector.broadcast %cst_12 : f32 to vector<256x128xf32>
    %20 = arith.addf %19, %18 : vector<256x128xf32>
    %21 = arith.divf %19, %20 : vector<256x128xf32>
    %22 = tpu.iota {dimensions = array<i32: 1>} : vector<256x128xi32>
    %c0_i32 = arith.constant 0 : i32
    %23 = vector.broadcast %c0_i32 : i32 to vector<256x128xi32>
    %24 = arith.cmpi eq, %22, %23 : vector<256x128xi32>
    %c9_i32 = arith.constant 9 : i32
    %25 = vector.broadcast %c9_i32 : i32 to vector<256x128xi32>
    %26 = arith.cmpi slt, %22, %25 : vector<256x128xi32>
    %c11_i32 = arith.constant 11 : i32
    %27 = vector.broadcast %c11_i32 : i32 to vector<256x128xi32>
    %28 = arith.cmpi slt, %22, %27 : vector<256x128xi32>
    %cst_13 = arith.constant 0.000000e+00 : f32
    %29 = vector.broadcast %cst_13 : f32 to vector<256x128xf32>
    %30 = arith.select %28, %21, %29 : vector<256x128xi1>, vector<256x128xf32>
    %31 = arith.select %26, %10, %30 : vector<256x128xi1>, vector<256x128xf32>
    %32 = arith.select %24, %8, %31 : vector<256x128xi1>, vector<256x128xf32>
    %c0_14 = arith.constant 0 : index
    %c0_15 = arith.constant 0 : index
    %33 = vector.load %arg6[%c0_14, %c0_15] : memref<256x128xf32, #tpu.memory_space<vmem>>, vector<256x128xf32>
    tpu.vector_store %arg6[%c0_14, %c0_15], %32 {strides = array<i32>} : memref<256x128xf32, #tpu.memory_space<vmem>>, vector<256x128xf32>,
    return
  }
  func.func @transform_0(%arg0: i32) -> (i32, i32) {
    %c0_i32 = arith.constant 0 : i32
    %c0_i32_0 = arith.constant 0 : i32
    return %arg0, %c0_i32 : i32, i32
  }
  func.func @transform_1(%arg0: i32) -> (i32, i32) {
    %c0_i32 = arith.constant 0 : i32
    %c0_i32_0 = arith.constant 0 : i32
    %c0_i32_1 = arith.constant 0 : i32
    return %c0_i32, %c0_i32_0 : i32, i32
  }
  func.func @transform_2(%arg0: i32) -> (i32, i32) {
    %c0_i32 = arith.constant 0 : i32
    %c0_i32_0 = arith.constant 0 : i32
    %c0_i32_1 = arith.constant 0 : i32
    return %c0_i32, %c0_i32_0 : i32, i32
  }
  func.func @transform_3(%arg0: i32) -> (i32, i32) {
    %c0_i32 = arith.constant 0 : i32
    %c0_i32_0 = arith.constant 0 : i32
    %c0_i32_1 = arith.constant 0 : i32
    return %c0_i32, %c0_i32_0 : i32, i32
  }
  func.func @transform_4(%arg0: i32) -> (i32, i32) {
    %c0_i32 = arith.constant 0 : i32
    %c0_i32_0 = arith.constant 0 : i32
    %c0_i32_1 = arith.constant 0 : i32
    return %c0_i32, %c0_i32_0 : i32, i32
  }
  func.func @transform_5(%arg0: i32) -> (i32, i32) {
    %c0_i32 = arith.constant 0 : i32
    %c0_i32_0 = arith.constant 0 : i32
    return %arg0, %c0_i32 : i32, i32
  }
}

module attributes {stable_mosaic.version = 11 : i64} {
  func.func @_extent_kernel(%arg0: i32, %arg1: memref<1x128x16xf32, #tpu.memory_space<vmem>>, %arg2: memref<1x2x64xf32, #tpu.memory_space<vmem>>, %arg3: memref<1x2x64xf32, #tpu.memory_space<vmem>>, %arg4: memref<1x1x1xf32, #tpu.memory_space<vmem>>) attributes {dimension_semantics = [#tpu.dimension_semantics<parallel>], iteration_bounds = array<i64: 2>, scalar_prefetch = 0 : i64, scratch_operands = 0 : i64, tpu.core_type = #tpu.core_type<tc>, window_params = [{transform_indices = @transform_0, window_bounds = array<i64: 1, 128, 16>}, {transform_indices = @transform_1, window_bounds = array<i64: 1, 2, 64>}, {transform_indices = @transform_2, window_bounds = array<i64: 1, 2, 64>}, {transform_indices = @transform_3, window_bounds = array<i64: 1, 1, 1>}]} {
    %c0 = arith.constant 0 : index
    %c0_0 = arith.constant 0 : index
    %c0_1 = arith.constant 0 : index
    %0 = vector.load %arg1[%c0, %c0_0, %c0_1] : memref<1x128x16xf32, #tpu.memory_space<vmem>>, vector<1x128x16xf32>
    %1 = vector.shape_cast %0 : vector<1x128x16xf32> to vector<128x16xf32>
    %2 = arith.truncf %1 : vector<128x16xf32> to vector<128x16xbf16>
    %3 = vector.extract_strided_slice %2 {offsets = [0, 0], sizes = [64, 16], strides = [1, 1]} : vector<128x16xbf16> to vector<64x16xbf16>
    %cst = arith.constant dense<0.000000e+00> : vector<128x64xf32>
    %4 = tpu.matmul %2, %3, %cst {dimension_numbers = #tpu.dot_dimension_numbers<[1], [1], [0], [0], [0, 0, 1, 0], [], []>} : vector<128x16xbf16>, vector<64x16xbf16>, vector<128x64xf32> -> vector<128x64xf32>
    %cst_2 = arith.constant 0.000000e+00 : f32
    %5 = vector.broadcast %cst_2 : f32 to vector<1x64xf32>
    %6 = vector.extract_strided_slice %4 {offsets = [64, 0], sizes = [64, 64], strides = [1, 1]} : vector<128x64xf32> to vector<64x64xf32>
    %cst_3 = arith.constant dense<0xFF800000> : vector<64xf32>
    %7 = vector.multi_reduction <maximumf>, %6, %cst_3 [0] : vector<64x64xf32> to vector<64xf32>
    %8 = vector.shape_cast %7 : vector<64xf32> to vector<1x64xf32>
    %9 = arith.addf %5, %8 : vector<1x64xf32>
    %cst_4 = arith.constant 1.000000e+00 : f32
    %10 = vector.broadcast %cst_4 : f32 to vector<1x64xf32>
    %11 = arith.mulf %9, %10 : vector<1x64xf32>
    %cst_5 = arith.constant dense<0xFF800000> : vector<1xf32>
    %12 = vector.multi_reduction <maximumf>, %11, %cst_5 [1] : vector<1x64xf32> to vector<1xf32>
    %13 = vector.shape_cast %12 : vector<1xf32> to vector<1x1xf32>
    %cst_6 = arith.constant 9.99999996E-13 : f32
    %14 = vector.broadcast %cst_6 : f32 to vector<1x1xf32>
    %15 = arith.addf %13, %14 : vector<1x1xf32>
    %16 = tpu.reciprocal %15 {approx = true} : vector<1x1xf32> -> vector<1x1xf32>
    %17 = vector.broadcast %16 : vector<1x1xf32> to vector<1x64xf32>
    %18 = arith.mulf %11, %17 : vector<1x64xf32>
    %19 = vector.extract_strided_slice %2 {offsets = [64, 0], sizes = [64, 16], strides = [1, 1]} : vector<128x16xbf16> to vector<64x16xbf16>
    %cst_7 = arith.constant dense<0.000000e+00> : vector<128x64xf32>
    %20 = tpu.matmul %2, %19, %cst_7 {dimension_numbers = #tpu.dot_dimension_numbers<[1], [1], [0], [0], [0, 0, 1, 0], [], []>} : vector<128x16xbf16>, vector<64x16xbf16>, vector<128x64xf32> -> vector<128x64xf32>
    %cst_8 = arith.constant 0.000000e+00 : f32
    %21 = vector.broadcast %cst_8 : f32 to vector<1x64xf32>
    %22 = vector.extract_strided_slice %20 {offsets = [0, 0], sizes = [64, 64], strides = [1, 1]} : vector<128x64xf32> to vector<64x64xf32>
    %cst_9 = arith.constant dense<0xFF800000> : vector<64xf32>
    %23 = vector.multi_reduction <maximumf>, %22, %cst_9 [0] : vector<64x64xf32> to vector<64xf32>
    %24 = vector.shape_cast %23 : vector<64xf32> to vector<1x64xf32>
    %25 = arith.addf %21, %24 : vector<1x64xf32>
    %cst_10 = arith.constant 1.000000e+00 : f32
    %26 = vector.broadcast %cst_10 : f32 to vector<1x64xf32>
    %27 = arith.mulf %25, %26 : vector<1x64xf32>
    %cst_11 = arith.constant dense<0xFF800000> : vector<1xf32>
    %28 = vector.multi_reduction <maximumf>, %27, %cst_11 [1] : vector<1x64xf32> to vector<1xf32>
    %29 = vector.shape_cast %28 : vector<1xf32> to vector<1x1xf32>
    %cst_12 = arith.constant 9.99999996E-13 : f32
    %30 = vector.broadcast %cst_12 : f32 to vector<1x1xf32>
    %31 = arith.addf %29, %30 : vector<1x1xf32>
    %32 = tpu.reciprocal %31 {approx = true} : vector<1x1xf32> -> vector<1x1xf32>
    %33 = vector.broadcast %32 : vector<1x1xf32> to vector<1x64xf32>
    %34 = arith.mulf %27, %33 : vector<1x64xf32>
    %35 = tpu.concatenate %18, %34 in 0 : vector<1x64xf32>, vector<1x64xf32> -> vector<2x64xf32>
    %c0_13 = arith.constant 0 : index
    %c0_14 = arith.constant 0 : index
    %c0_15 = arith.constant 0 : index
    %36 = vector.load %arg3[%c0_13, %c0_14, %c0_15] : memref<1x2x64xf32, #tpu.memory_space<vmem>>, vector<1x2x64xf32>
    %37 = vector.shape_cast %36 : vector<1x2x64xf32> to vector<2x64xf32>
    %38 = vector.shape_cast %35 : vector<2x64xf32> to vector<1x2x64xf32>
    tpu.vector_store %arg3[%c0_13, %c0_14, %c0_15], %38 {strides = array<i32>} : memref<1x2x64xf32, #tpu.memory_space<vmem>>, vector<1x2x64xf32>,
    %c0_16 = arith.constant 0 : index
    %c0_17 = arith.constant 0 : index
    %c0_18 = arith.constant 0 : index
    %39 = vector.load %arg2[%c0_16, %c0_17, %c0_18] : memref<1x2x64xf32, #tpu.memory_space<vmem>>, vector<1x2x64xf32>
    %40 = vector.shape_cast %39 : vector<1x2x64xf32> to vector<2x64xf32>
    %41 = arith.negf %40 : vector<2x64xf32>
    %42 = math.exp %41 : vector<2x64xf32>
    %cst_19 = arith.constant 1.000000e+00 : f32
    %43 = vector.broadcast %cst_19 : f32 to vector<2x64xf32>
    %44 = arith.addf %43, %42 : vector<2x64xf32>
    %45 = arith.divf %43, %44 : vector<2x64xf32>
    %46 = arith.subf %45, %35 : vector<2x64xf32>
    %47 = arith.mulf %46, %46 : vector<2x64xf32>
    %48 = vector.shape_cast %47 : vector<2x64xf32> to vector<1x2x64xf32>
    %cst_20 = arith.constant dense<0.000000e+00> : vector<1xf32>
    %49 = vector.multi_reduction <add>, %48, %cst_20 [1, 2] : vector<1x2x64xf32> to vector<1xf32>
    %50 = vector.shape_cast %49 : vector<1xf32> to vector<1x1x1xf32>
    %51 = vector.extract %50[0, 0, 0] : f32 from vector<1x1x1xf32>
    %52 = vector.broadcast %51 : f32 to vector<1x1x1xf32>
    %c0_21 = arith.constant 0 : index
    %c0_22 = arith.constant 0 : index
    %c0_23 = arith.constant 0 : index
    %53 = vector.load %arg4[%c0_21, %c0_22, %c0_23] : memref<1x1x1xf32, #tpu.memory_space<vmem>>, vector<1x1x1xf32>
    tpu.vector_store %arg4[%c0_21, %c0_22, %c0_23], %52 {strides = array<i32>} : memref<1x1x1xf32, #tpu.memory_space<vmem>>, vector<1x1x1xf32>,
    return
  }
  func.func @transform_0(%arg0: i32) -> (i32, i32, i32) {
    %c0_i32 = arith.constant 0 : i32
    %c0_i32_0 = arith.constant 0 : i32
    %c0_i32_1 = arith.constant 0 : i32
    return %arg0, %c0_i32, %c0_i32_0 : i32, i32, i32
  }
  func.func @transform_1(%arg0: i32) -> (i32, i32, i32) {
    %c0_i32 = arith.constant 0 : i32
    %c0_i32_0 = arith.constant 0 : i32
    %c0_i32_1 = arith.constant 0 : i32
    return %arg0, %c0_i32, %c0_i32_0 : i32, i32, i32
  }
  func.func @transform_2(%arg0: i32) -> (i32, i32, i32) {
    %c0_i32 = arith.constant 0 : i32
    %c0_i32_0 = arith.constant 0 : i32
    %c0_i32_1 = arith.constant 0 : i32
    return %arg0, %c0_i32, %c0_i32_0 : i32, i32, i32
  }
  func.func @transform_3(%arg0: i32) -> (i32, i32, i32) {
    %c0_i32 = arith.constant 0 : i32
    %c0_i32_0 = arith.constant 0 : i32
    %c0_i32_1 = arith.constant 0 : i32
    return %arg0, %c0_i32, %c0_i32_0 : i32, i32, i32
  }
}

</mosaic_0001>

<bundles_post_ra>
// kernel: squeeze.6
= control target key start
LH: loop header
LB: loop body
LE: loop exit
PB: predicated region body
PF: predicated region fallthrough
CT: control target
= control target key end

     0   :  { %vm7_vm0 = vcmask 523264   ;;  %s49_s0 = inlined_call_operand.vmem [shape: f32[256], index: 0, kind: input, shape index: {}]   ;;  %s50_s1 = inlined_call_operand.vmem [shape: f32[2,2,64], index: 1, kind: output, shape index: {}]  }
   0x1   :  { %v4_v0 = vld [vmem:[%s49_s0] sm:$0x3]  ;;  %s29_s0 = smov 64  }
   0x2   :  { %5 = vst [vmem:[#allocation1] sm:$0x3] %v4_v0 }
   0x9   :  { %v9_v1 = vld [vmem:[#allocation1] sm:$0x3]  }
   0xa   :  { %v6_v2 = vld [vmem:[#allocation1] sm:$0x3]   ;;  %10 = vrot.lane.b32.xlu0 %v9_v1, %s29_s0 }
   0xb   :  { %8 = vst.msk [vmem:[#allocation0] ss:$8 sm:$0x3] %vm7_vm0, %v6_v2  }
  0x7c   :  { %v11_v3 = vpop.permute.xlu0 %10  }
  0x7d   :  { %14 = vst.msk [vmem:[#allocation0 + $0x1] ss:$8 sm:$0x3] %vm7_vm0, %v11_v3  }
  0x84   :  { %v17_v4 = vld [vmem:[#allocation0] sm:$0x3]  ;;  %v22_v5 = vld [vmem:[#allocation0 + $0x8] sm:$0x3] }
  0x85   :  { %20 = vst [vmem:[%s50_s1] sm:$0x3] %v17_v4 }
  0x86   :  { %27 = vst [vmem:[%s50_s1 + $0x2] sm:$0x3] %v22_v5 }

// kernel: scl_forward.3
= control target key start
LH: loop header
LB: loop body
LE: loop exit
PB: predicated region body
PF: predicated region fallthrough
CT: control target
= control target key end

     0   :  { %s644_s12 = smov 0   ;;  %s746_s0 = inlined_call_operand.vmem [shape: f32[2,128,16], index: 0, kind: input, shape index: {}]   ;;  %s747_s1 = inlined_call_operand.vmem [shape: f32[2,2,64], index: 1, kind: input, shape index: {}]   ;;  %s748_s2 = inlined_call_operand.vmem [shape: f32[2,2,64], index: 2, kind: output, shape index: {0}]   ;;  %s749_s3 = inlined_call_operand.vmem [shape: f32[2,1,1], index: 3, kind: output, shape index: {1}]  }
   0x1 LB: > { %s561_s13 = sadd.s32 4294967295, %s622_s12   ;;  %p565_p0 = scmp.ge.s32.totalorder %s622_s12, 1  ;;  %s622_s12 = sphi %s644_s12, %s14_s12  }
   0x2   : > { %p149_p1 = scmp.lt.s32.totalorder %s622_s12, 3 }
   0x4   : > { %p150_p2 = pnand %p565_p0, %p149_p1 }
   0x5   : > { %p179_p3 = scmp.lt.s32.totalorder (!%p150_p2), %s561_s13, 1 }
   0x6   : > { %153 = sbr.rel (%p150_p2) target bundleno = 582 (0x246), region = 28 }
   0xb   : > { %s751_s13 = smov (!%p179_p3, %s561_s13), 1  ;;  %vm268_vm0 = vcmask 130048   ;;  %vm334_vm1 = vcmask 523264   ;;  %vm432_vm6 = vcmask 1040384   ;;  %vm434_vm7 = vcmask 517120  }
   0xc   : > { %s589_s14 = sshll.u32 %s751_s13, 7  ;;  %s568_s18 = sshll.u32 %s751_s13, 1  ;;  %vm469_vm8 = vcmask 0  }
   0xd   : > { %s658_s17 = scalar_lea.vmem %s746_s0, %s589_s14  ;;  %s187_s21 = scalar_lea.vmem %s747_s1, %s568_s18 }
   0xe   : > { %v202_v0 = vld [vmem:[%s658_s17 + $0x30] sm:$0xff]  ;;  %v203_v1 = vld [vmem:[%s658_s17 + $0x38] sm:$0xff]  ;;  %v200_v7 = vld [vmem:[%s658_s17 + $0x20] sm:$0xff]  ;;  %s191_s24 = scalar_lea.vmem %s748_s2, %s568_s18  ;;  %s194_s27 = scalar_lea.vmem %s749_s3, %s751_s13 }
   0xf   : > { %v210_v2 = vld [vmem:[%s658_s17 + $0x70] sm:$0xff]  ;;  %v218_v3 = vpack.c.bf16 %v202_v0, %v202_v0  ;;  %v219_v4 = vpack.c.bf16 %v203_v1, %v203_v1  ;;  %v211_v5 = vld [vmem:[%s658_s17 + $0x78] sm:$0xff]  ;;  %v201_v8 = vld [vmem:[%s658_s17 + $0x28] sm:$0xff]  ;;  %v216_v10 = vpack.c.bf16 %v200_v7, %v200_v7 }
  0x10   : > { %v226_v6 = vpack.c.bf16 %v210_v2, %v210_v2  ;;  %v227_v9 = vpack.c.bf16 %v211_v5, %v211_v5  ;;  %v217_v11 = vpack.c.bf16 %v201_v8, %v201_v8  ;;  %v208_v12 = vld [vmem:[%s658_s17 + $0x60] sm:$0xff]  ;;  %v209_v13 = vld [vmem:[%s658_s17 + $0x68] sm:$0xff]  ;;  %v198_v26 = vld [vmem:[%s658_s17 + $0x10] sm:$0xff] }
  0x11   : > { %v250_v14 = vunpack.c.l.b16 %v218_v3  ;;  %v251_v15 = vunpack.c.l.b16 %v219_v4  ;;  %v224_v17 = vpack.c.bf16 %v208_v12, %v208_v12  ;;  %v225_v19 = vpack.c.bf16 %v209_v13, %v209_v13  ;;  %v199_v27 = vld [vmem:[%s658_s17 + $0x18] sm:$0xff]  ;;  %v206_v29 = vld [vmem:[%s658_s17 + $0x50] sm:$0xff]  ;;  %v196_v44 = vld [vmem:[%s658_s17] sm:$0xff] }
  0x12   : > { %v258_v16 = vunpack.c.l.b16 %v226_v6  ;;  %v259_v18 = vunpack.c.l.b16 %v227_v9  ;;  %v248_v21 = vunpack.c.l.b16 %v216_v10  ;;  %v249_v22 = vunpack.c.l.b16 %v217_v11  ;;  %v207_v30 = vld [vmem:[%s658_s17 + $0x58] sm:$0xff]  ;;  %v197_v45 = vld [vmem:[%s658_s17 + $0x8] sm:$0xff]  ;;  %v204_v46 = vld [vmem:[%s658_s17 + $0x40] sm:$0xff] }
  0x13   : > { %v668_v20 = vpack.c.b16 %v251_v15, %v250_v14  ;;  %v256_v24 = vunpack.c.l.b16 %v224_v17  ;;  %v257_v25 = vunpack.c.l.b16 %v225_v19  ;;  %v214_v33 = vpack.c.bf16 %v198_v26, %v198_v26  ;;  %v205_v47 = vld [vmem:[%s658_s17 + $0x48] sm:$0xff] }
  0x14   : > { %v670_v23 = vpack.c.b16 %v259_v18, %v258_v16  ;;  %v262_v32 = vpack.c.b16 %v249_v22, %v248_v21  ;;  %v215_v34 = vpack.c.bf16 %v199_v27, %v199_v27  ;;  %v222_v36 = vpack.c.bf16 %v206_v29, %v206_v29 }
  0x15   : > { %v279_v28 = vsel %vm268_vm0, %v668_v20, 0  ;;  %v266_v35 = vpack.c.b16 %v257_v25, %v256_v24  ;;  %v223_v37 = vpack.c.bf16 %v207_v30, %v207_v30  ;;  %v246_v39 = vunpack.c.l.b16 %v214_v33 }
  0x16   : > { %590 = vmatpush.bf16.xpose.msra.mxu2 %v279_v28  ;;  %v291_v31 = vsel %vm268_vm0, %v670_v23, 0  ;;  %297 = vmatpush.bf16.xpose.msra.mxu0 %v279_v28  ;;  %v276_v38 = vsel %vm268_vm0, %v262_v32, 0  ;;  %v247_v40 = vunpack.c.l.b16 %v215_v34  ;;  %v254_v42 = vunpack.c.l.b16 %v222_v36 }
  0x17   : > { %367 = vmatpush.bf16.xpose.msra.mxu1 %v291_v31  ;;  %594 = vmatpush.bf16.xpose.msra.mxu3 %v291_v31  ;;  %v288_v41 = vsel %vm268_vm0, %v266_v35, 0  ;;  %v255_v43 = vunpack.c.l.b16 %v223_v37  ;;  %v212_v49 = vpack.c.bf16 %v196_v44, %v196_v44  ;;  %v213_v50 = vpack.c.bf16 %v197_v45, %v197_v45 }
  0x18   : > { %v261_v48 = vpack.c.b16 %v247_v40, %v246_v39  ;;  %v220_v52 = vpack.c.bf16 %v204_v46, %v204_v46  ;;  %v221_v53 = vpack.c.bf16 %v205_v47, %v205_v47 }
  0x19   : > { %v265_v51 = vpack.c.b16 %v255_v43, %v254_v42  ;;  %v244_v55 = vunpack.c.l.b16 %v212_v49  ;;  %v245_v56 = vunpack.c.l.b16 %v213_v50 }
  0x1a   : > { %v273_v54 = vsel %vm268_vm0, %v261_v48, 0  ;;  %v252_v58 = vunpack.c.l.b16 %v220_v52  ;;  %v253_v59 = vunpack.c.l.b16 %v221_v53 }
  0x1b   : > { %v285_v57 = vsel %vm268_vm0, %v265_v51, 0  ;;  %v260_v60 = vpack.c.b16 %v245_v56, %v244_v55 }
  0x1c   : > { %v264_v61 = vpack.c.b16 %v253_v59, %v252_v58 }
  0x1d   : > { %v270_v62 = vsel %vm268_vm0, %v260_v60, 0 }
  0x1e   : > { %591 = vmatpush.bf16.xpose.msra.mxu2 %v276_v38  ;;  %298 = vmatpush.bf16.xpose.msra.mxu0 %v276_v38  ;;  %v282_v63 = vsel %vm268_vm0, %v264_v61, 0 }
  0x1f   : > { %368 = vmatpush.bf16.xpose.msra.mxu1 %v288_v41  ;;  %595 = vmatpush.bf16.xpose.msra.mxu3 %v288_v41 }
  0x26   : > { %592 = vmatpush.bf16.xpose.msra.mxu2 %v273_v54  ;;  %299 = vmatpush.bf16.xpose.msra.mxu0 %v273_v54 }
  0x27   : > { %369 = vmatpush.bf16.xpose.msra.mxu1 %v285_v57  ;;  %596 = vmatpush.bf16.xpose.msra.mxu3 %v285_v57 }
  0x2e   : > { %593 = vmatpush.bf16.xpose.msra.mxu2 %v270_v62  ;;  %300 = vmatpush.bf16.xpose.msra.mxu0 %v270_v62 }
  0x2f   : > { %370 = vmatpush.bf16.xpose.msra.mxu1 %v282_v63  ;;  %597 = vmatpush.bf16.xpose.msra.mxu3 %v282_v63 }
  0x35   : > { %574 = vmatmul.msk.bf16.vlgmr.msra.gmra.mxu2 %vm268_vm0, %v264_v61  ;;  %570 = vmatmul.msk.bf16.vlgmr.msra.gmra.mxu0 %vm268_vm0, %v260_v60 }
  0x36   : > { %578 = vmatmul.msk.bf16.vlgmr.msra.gmra.mxu1 %vm268_vm0, %v260_v60  ;;  %582 = vmatmul.msk.bf16.vlgmr.msra.gmra.mxu3 %vm268_vm0, %v264_v61 }
  0x45   : > { %575 = vmatmul.msk.bf16.gmra.mxu2 %vm268_vm0, %v265_v51  ;;  %571 = vmatmul.msk.bf16.gmra.mxu0 %vm268_vm0, %v261_v48 }
  0x46   : > { %579 = vmatmul.msk.bf16.gmra.mxu1 %vm268_vm0, %v261_v48  ;;  %583 = vmatmul.msk.bf16.gmra.mxu3 %vm268_vm0, %v265_v51 }
  0x55   : > { %576 = vmatmul.msk.bf16.gmra.mxu2 %vm268_vm0, %v266_v35  ;;  %572 = vmatmul.msk.bf16.gmra.mxu0 %vm268_vm0, %v262_v32 }
  0x56   : > { %580 = vmatmul.msk.bf16.gmra.mxu1 %vm268_vm0, %v262_v32  ;;  %584 = vmatmul.msk.bf16.gmra.mxu3 %vm268_vm0, %v266_v35 }
  0x65   : > { %577 = vmatmul.msk.bf16.gmra.mxu2 %vm268_vm0, %v670_v23  ;;  %573 = vmatmul.msk.bf16.gmra.mxu0 %vm268_vm0, %v668_v20 }
  0x66   : > { %581 = vmatmul.msk.bf16.gmra.mxu1 %vm268_vm0, %v668_v20  ;;  %585 = vmatmul.msk.bf16.gmra.mxu3 %vm268_vm0, %v670_v23 }
  0xb2   : > { %v302_v0 = vpop.f32.mrf.mxu0 }
  0xb3   : > { %v372_v1 = vpop.f32.mrf.mxu1 }
  0xb4   : > { %v404_v35 = vsel %vm334_vm1, %v372_v1, -inf }
  0xb8   : > { %v314_v2 = vpop.f32.mrf.mxu2 }
  0xb9   : > { %v392_v3 = vpop.f32.mrf.mxu3  ;;  %v335_v48 = vsel %vm334_vm1, %v314_v2, -inf }
  0xba   : > { %v303_v4 = vpop.f32.mrf.mxu0 }
  0xbb   : > { %v374_v5 = vpop.f32.mrf.mxu1 }
  0xbc   : > { %v405_v29 = vsel %vm334_vm1, %v374_v5, -inf }
  0xc0   : > { %v316_v6 = vpop.f32.mrf.mxu2 }
  0xc1   : > { %v393_v7 = vpop.f32.mrf.mxu3  ;;  %v336_v43 = vsel %vm334_vm1, %v316_v6, -inf }
  0xc2   : > { %v305_v8 = vpop.f32.mrf.mxu0 }
  0xc3   : > { %v377_v9 = vpop.f32.mrf.mxu1 }
  0xc4   : > { %v406_v36 = vsel %vm334_vm1, %v377_v9, -inf }
  0xc8   : > { %v319_v10 = vpop.f32.mrf.mxu2 }
  0xc9   : > { %v395_v11 = vpop.f32.mrf.mxu3  ;;  %v337_v51 = vsel %vm334_vm1, %v319_v10, -inf }
  0xca   : > { %v306_v12 = vpop.f32.mrf.mxu0 }
  0xcb   : > { %v379_v13 = vpop.f32.mrf.mxu1  ;;  %v436_v12 = vld [vmem:[%s187_s21] sm:$0x3] }
  0xcc   : > { %v407_v37 = vsel %vm334_vm1, %v379_v13, -inf  ;;  %v586_v13 = vmul.f32 -1.442695, %v436_v12 }
  0xce   : > { %608 = vpow2.f32 %v586_v13 }
  0xd0   : > { %v321_v14 = vpop.f32.mrf.mxu2 }
  0xd1   : > { %v396_v15 = vpop.f32.mrf.mxu3  ;;  %v338_v52 = vsel %vm334_vm1, %v321_v14, -inf }
  0xd2   : > { %v308_v16 = vpop.f32.mrf.mxu0 }
  0xd3   : > { %v382_v17 = vpop.f32.mrf.mxu1 }
  0xd4   : > { %v408_v30 = vsel %vm334_vm1, %v382_v17, -inf  ;;  %v609_v14 = vpop.eup %608 }
  0xd5   : > { %v409_v39 = vmax.f32 %v404_v35, %v408_v30  ;;  %v440_v15 = vadd.f32 1.0, %v609_v14 }
  0xd7   : > { %610 = vrcp.f32 %v440_v15  ;;  %vm446_vm2 = vweird.f32 %v440_v15 }
  0xd8   : > { %v324_v18 = vpop.f32.mrf.mxu2 }
  0xd9   : > { %v398_v19 = vpop.f32.mrf.mxu3  ;;  %v339_v44 = vsel %vm334_vm1, %v324_v18, -inf }
  0xda   : > { %v309_v20 = vpop.f32.mrf.mxu0  ;;  %v340_v56 = vmax.f32 %v335_v48, %v339_v44 }
  0xdb   : > { %v384_v21 = vpop.f32.mrf.mxu1 }
  0xdc   : > { %v410_v26 = vsel %vm334_vm1, %v384_v21, -inf }
  0xdd   : > { %v411_v33 = vmax.f32 %v405_v29, %v410_v26  ;;  %v611_v16 = vpop.eup %610  ;;  %v450_v26 = vand.u32 2147483647, %v440_v15 }
  0xde   : > { %v442_v17 = vmul.f32 %v611_v16, %v440_v15  ;;  %vm447_vm3 = vweird.f32 %v611_v16 }
  0xdf   : > { %v416_v45 = vmax.f32 %v409_v39, %v411_v33  ;;  %vm448_vm4 = vmor %vm446_vm2, %vm447_vm3  ;;  %vm451_vm5 = vcmp.eq.f32.partialorder %v450_v26, 8.507059e+37 }
  0xe0   : > { %v326_v22 = vpop.f32.mrf.mxu2  ;;  %v443_v19 = vsub.f32 1.0, %v442_v17 }
  0xe1   : > { %v399_v23 = vpop.f32.mrf.mxu3  ;;  %v341_v40 = vsel %vm334_vm1, %v326_v22, -inf }
  0xe2   : > { %v311_v24 = vpop.f32.mrf.mxu0  ;;  %v342_v49 = vmax.f32 %v336_v43, %v341_v40  ;;  %v444_v21 = vmul.f32 %v611_v16, %v443_v19 }
  0xe3   : > { %v387_v25 = vpop.f32.mrf.mxu1  ;;  %v452_v24 = vand.u32 2147483648, %v440_v15 }
  0xe4   : > { %v412_v31 = vsel %vm334_vm1, %v387_v25, -inf  ;;  %v347_v59 = vmax.f32 %v340_v56, %v342_v49  ;;  %v445_v25 = vadd.f32 %v611_v16, %v444_v21 }
  0xe5   : > { %v413_v41 = vmax.f32 %v406_v36, %v412_v31 }
  0xe6   : > { %v449_v29 = vsel %vm448_vm4, %v611_v16, %v445_v25 }
  0xe8   : > { %v329_v27 = vpop.f32.mrf.mxu2 }
  0xe9   : > { %v401_v28 = vpop.f32.mrf.mxu3  ;;  %v343_v46 = vsel %vm334_vm1, %v329_v27, -inf  ;;  %v453_v27 = vor.u32 1.1754944e-38, %v452_v24 }
  0xea   : > { %v312_v32 = vpop.f32.mrf.mxu0  ;;  %v344_v57 = vmax.f32 %v337_v51, %v343_v46 }
  0xeb   : > { %v389_v34 = vpop.f32.mrf.mxu1  ;;  %v454_v33 = vsel %vm451_vm5, %v453_v27, %v449_v29 }
  0xec   : > { %v414_v38 = vsel %vm334_vm1, %v389_v34, -inf }
  0xed   : > { %v415_v42 = vmax.f32 %v407_v37, %v414_v38 }
  0xef   : > { %v417_v47 = vmax.f32 %v413_v41, %v415_v42 }
  0xf0   : > { %v331_v50 = vpop.f32.mrf.mxu2 }
  0xf1   : > { %v418_v53 = vmax.f32 %v416_v45, %v417_v47  ;;  %v345_v54 = vsel %vm334_vm1, %v331_v50, -inf  ;;  %v402_v55 = vpop.f32.mrf.mxu3 }
  0xf2   : > { %v346_v58 = vmax.f32 %v338_v52, %v345_v54 }
  0xf3   : > { %v419_v60 = vrot.slane %v418_v53, 4 }
  0xf4   : > { %v348_v61 = vmax.f32 %v344_v57, %v346_v58 }
  0xf5   : > { %v420_v0 = vmax.f32 %v418_v53, %v419_v60 }
  0xf6   : > { %v349_v62 = vmax.f32 %v347_v59, %v348_v61 }
  0xf7   : > { %v421_v3 = vrot.slane %v420_v0, 2 }
  0xf8   : > { %v350_v63 = vrot.slane %v349_v62, 4 }
  0xf9   : > { %v422_v6 = vmax.f32 %v420_v0, %v421_v3 }
  0xfa   : > { %v351_v1 = vmax.f32 %v349_v62, %v350_v63 }
  0xfb   : > { %v423_v9 = vrot.slane %v422_v6, 1 }
  0xfc   : > { %v352_v2 = vrot.slane %v351_v1, 2 }
  0xfd   : > { %v424_v10 = vmax.f32 %v422_v6, %v423_v9 }
  0xfe   : > { %v353_v4 = vmax.f32 %v351_v1, %v352_v2 }
  0xff   : > { %v426_v11 = vsel %vm334_vm1, %v424_v10, -inf }
 0x100   : > { %v354_v5 = vrot.slane %v353_v4, 1 }
 0x102   : > { %v355_v7 = vmax.f32 %v353_v4, %v354_v5 }
 0x104   : > { %v357_v8 = vsel %vm334_vm1, %v355_v7, -inf }
 0x105   : > { %358 = vmax.xlane.f32.xlu0 %v357_v8 }
 0x10d   : > { %427 = vmax.xlane.f32.xlu0 %v426_v11 }
 0x178   : > { %v359_v18 = vpop.xlane.xlu0 %358 }
 0x179   : > { %v360_v20 = vadd.f32 1e-12, %v359_v18 }
 0x17b   : > { %612 = vrcp.f32 %v360_v20 }
 0x180   : > { %v428_v22 = vpop.xlane.xlu0 %427 }
 0x181   : > { %v429_v23 = vadd.f32 1e-12, %v428_v22  ;;  %v613_v28 = vpop.eup %612 }
 0x182   : > { %v362_v32 = vmul.f32 %v613_v28, %v355_v7 }
 0x183   : > { %614 = vrcp.f32 %v429_v23 }
 0x189   : > { %v615_v30 = vpop.eup %614 }
 0x18a   : > { %v431_v31 = vmul.f32 %v615_v30, %v424_v10 }
 0x18c   : > { %v433_v34 = vsel %vm432_vm6, %v362_v32, %v431_v31 }
 0x18d   : > { %v456_v35 = vsub.f32 %v454_v33, %v433_v34  ;;  %435 = vst.msk [vmem:[%s191_s24] sm:$0x3] %vm434_vm7, %v433_v34 }
 0x18f   : > { %v457_v36 = vmul.f32 %v456_v35, %v456_v35 }
 0x191   : > { %v458_v37 = vsel %vm434_vm7, %v457_v36, 0.0 }
 0x192   : > { %459 = vadd.xlane.f32.xlu1 %v458_v37 }
 0x205   : > { %v460_v38 = vpop.xlane.xlu1 %459 }
 0x206   : > { %v461_v39 = vrot.slane %v460_v38, 4 }
 0x208   : > { %v462_v40 = vadd.f32 %v461_v39, %v460_v38 }
 0x20a   : > { %v463_v41 = vrot.slane %v462_v40, 2 }
 0x20c   : > { %v464_v42 = vadd.f32 %v463_v41, %v462_v40 }
 0x20e   : > { %v465_v43 = vrot.slane %v464_v42, 1 }
 0x210   : > { %v466_v44 = vadd.f32 %v465_v43, %v464_v42 }
 0x212   : > { %598 = vpush %v466_v44 }
 0x243   : > { %s599_s28 = spop %598 }
 0x244   : > { %v468_v45 = vstv %s599_s28 }
 0x245   : > { %470 = vst.msk [vmem:[%s194_s27] sm:$0x1] %vm469_vm8, %v468_v45 }
 0x246 PF: > { %s14_s12 = sadd.s32 1, %s622_s12  }
 0x247   : > { %p11_p4 = scmp.ge.s32.totalorder %s14_s12, 4  }
 0x249   :  { %13 = sbr.rel (!%p11_p4) target bundleno = 1 (0x1), region = 73 }

// kernel: scl_forward.2
= control target key start
LH: loop header
LB: loop body
LE: loop exit
PB: predicated region body
PF: predicated region fallthrough
CT: control target
= control target key end

     0   :  { %10 = vsyncpa [#allocation3], 0  ;;  %s1480_s21 = smov [#allocation2]   ;;  %s1481_s23 = smov 128   ;;  %s2199_s0 = inlined_call_operand.hbm [shape: f32[256,16], index: 0, kind: input, shape index: {}]   ;;  %s2200_s1 = inlined_call_operand.vmem [shape: bf16[16,128], index: 1, kind: input, shape index: {}]   ;;  %s2201_s2 = inlined_call_operand.vmem [shape: f32[1,128], index: 2, kind: input, shape index: {}]   ;;  %s2202_s3 = inlined_call_operand.vmem [shape: bf16[128,128], index: 3, kind: input, shape index: {}]   ;;  %s2203_s4 = inlined_call_operand.vmem [shape: f32[1,128], index: 4, kind: input, shape index: {}]   ;;  %s2204_s5 = inlined_call_operand.vmem [shape: f32[256,128], index: 5, kind: output, shape index: {}]  }
   0x1   :  { %s15_s20 = sshll.u32 %s2199_s0, 4  ;;  %s17_s22 = sshll.u32 %s1480_s21, 4  ;;  %s16_s20 = int_to_ptr.hbm [resolvable:$true] %s15_s20  ;;  %s18_s22 = int_to_ptr.vmem [resolvable:$true] %s17_s22 }
   0x2   :  { %s1482_s24 = smov 8  }
   0x3   :  { %23 = dma.hbm_to_vmem [thread:$0]  %s16_s20, 4096, %s18_s22, [#allocation3], %s1481_s23, %s1481_s23, %s1482_s24  }
   0x4   :  { %1478 = dma.done.wait [#allocation3], 4096  }
   0x5   :  { %1479 = vsyncadd [#allocation3], 4294963200  ;;  %v1302_v0 = vld [vmem:[%s2200_s1] sm:$0xff]  ;;  %v38_v2 = vld [vmem:[#allocation2 + $0x8] sm:$0xff]  ;;  %vm129_vm0 = vcmask 130048  }
   0x6   :  { %v37_v1 = vld [vmem:[#allocation2] sm:$0xff]  ;;  %v70_v4 = vmax.f32 %v38_v2, 0.0  ;;  %185 = vmatpush.bf16.msra.mxu0 %v1302_v0  ;;  %1311 = vmatpush.bf16.msra.mxu3 %v1302_v0  ;;  %v39_v6 = vld [vmem:[#allocation2 + $0x10] sm:$0xff]  ;;  %v40_v7 = vld [vmem:[#allocation2 + $0x18] sm:$0xff] }
   0x7   :  { %v69_v3 = vmax.f32 %v37_v1, 0.0  ;;  %v71_v8 = vmax.f32 %v39_v6, 0.0  ;;  %v72_v9 = vmax.f32 %v40_v7, 0.0  ;;  %v41_v11 = vld [vmem:[#allocation2 + $0x20] sm:$0xff]  ;;  %v42_v12 = vld [vmem:[#allocation2 + $0x28] sm:$0xff]  ;;  %v43_v16 = vld [vmem:[#allocation2 + $0x30] sm:$0xff] }
   0x8   :  { %v73_v13 = vmax.f32 %v41_v11, 0.0  ;;  %v74_v14 = vmax.f32 %v42_v12, 0.0  ;;  %v44_v17 = vld [vmem:[#allocation2 + $0x38] sm:$0xff]  ;;  %v75_v18 = vmax.f32 %v43_v16, 0.0  ;;  %v45_v21 = vld [vmem:[#allocation2 + $0x40] sm:$0xff]  ;;  %v46_v22 = vld [vmem:[#allocation2 + $0x48] sm:$0xff] }
   0x9   :  { %v101_v5 = vpack.c.bf16 %v70_v4, %v69_v3  ;;  %v102_v10 = vpack.c.bf16 %v72_v9, %v71_v8  ;;  %v76_v19 = vmax.f32 %v44_v17, 0.0  ;;  %v77_v23 = vmax.f32 %v45_v21, 0.0  ;;  %v1310_v26 = vld [vmem:[%s2202_s3 + $0x38] sm:$0xff]  ;;  %v47_v27 = vld [vmem:[#allocation2 + $0x50] sm:$0xff]  ;;  %v1308_v33 = vld [vmem:[%s2202_s3 + $0x28] sm:$0xff] }
   0xa   :  { %v103_v15 = vpack.c.bf16 %v74_v14, %v73_v13  ;;  %v78_v24 = vmax.f32 %v46_v22, 0.0  ;;  %383 = vmatpush.bf16.msra.mxu1 %v1310_v26  ;;  %1312 = vmatpush.bf16.msra.mxu2 %v1310_v26  ;;  %v48_v28 = vld [vmem:[#allocation2 + $0x58] sm:$0xff]  ;;  %v79_v29 = vmax.f32 %v47_v27, 0.0  ;;  %v1309_v32 = vld [vmem:[%s2202_s3 + $0x30] sm:$0xff]  ;;  %v49_v34 = vld [vmem:[#allocation2 + $0x60] sm:$0xff] }
   0xb   :  { %1222 = vmatmul.msk.bf16.vlgmr.msra.gmra.mxu0 %vm129_vm0, %v101_v5  ;;  %v104_v20 = vpack.c.bf16 %v76_v19, %v75_v18  ;;  %v80_v30 = vmax.f32 %v48_v28, 0.0  ;;  %v50_v35 = vld [vmem:[#allocation2 + $0x68] sm:$0xff]  ;;  %v1307_v36 = vld [vmem:[%s2202_s3 + $0x20] sm:$0xff]  ;;  %v81_v37 = vmax.f32 %v49_v34, 0.0  ;;  %v1306_v39 = vld [vmem:[%s2202_s3 + $0x18] sm:$0xff] }
   0xc   :  { %v105_v25 = vpack.c.bf16 %v78_v24, %v77_v23  ;;  %v82_v38 = vmax.f32 %v50_v35, 0.0  ;;  %v55_v41 = vld [vmem:[#allocation2 + $0x90] sm:$0xff]  ;;  %v56_v42 = vld [vmem:[#allocation2 + $0x98] sm:$0xff]  ;;  %v1304_v47 = vld [vmem:[%s2202_s3 + $0x8] sm:$0xff] }
   0xd   :  { %v106_v31 = vpack.c.bf16 %v80_v30, %v79_v29  ;;  %v87_v43 = vmax.f32 %v55_v41, 0.0  ;;  %v88_v44 = vmax.f32 %v56_v42, 0.0  ;;  %v1305_v45 = vld [vmem:[%s2202_s3 + $0x10] sm:$0xff]  ;;  %v52_v49 = vld [vmem:[#allocation2 + $0x78] sm:$0xff]  ;;  %v1303_v50 = vld [vmem:[%s2202_s3] sm:$0xff] }
   0xe   :  { %384 = vmatpush.bf16.msra.mxu1 %v1309_v32  ;;  %1313 = vmatpush.bf16.msra.mxu2 %v1309_v32  ;;  %v107_v40 = vpack.c.bf16 %v82_v38, %v81_v37  ;;  %v51_v48 = vld [vmem:[#allocation2 + $0x70] sm:$0xff]  ;;  %v84_v52 = vmax.f32 %v52_v49, 0.0  ;;  %v57_v54 = vld [vmem:[#allocation2 + $0xa0] sm:$0xff]  ;;  %v58_v55 = vld [vmem:[#allocation2 + $0xa8] sm:$0xff] }
   0xf   :  { %v110_v46 = vpack.c.bf16 %v88_v44, %v87_v43  ;;  %v83_v51 = vmax.f32 %v51_v48, 0.0  ;;  %v89_v56 = vmax.f32 %v57_v54, 0.0  ;;  %v90_v57 = vmax.f32 %v58_v55, 0.0  ;;  %v53_v59 = vld [vmem:[#allocation2 + $0x80] sm:$0xff]  ;;  %v54_v60 = vld [vmem:[#allocation2 + $0x88] sm:$0xff]  ;;  %v59_v1 = vld [vmem:[#allocation2 + $0xb0] sm:$0xff] }
  0x10   :  { %v85_v61 = vmax.f32 %v53_v59, 0.0  ;;  %v86_v62 = vmax.f32 %v54_v60, 0.0  ;;  %v60_v2 = vld [vmem:[#allocation2 + $0xb8] sm:$0xff]  ;;  %v91_v3 = vmax.f32 %v59_v1, 0.0  ;;  %v1556_v5 = vld [vmem:[%s2201_s2] ss:$0 sm:$0xff] }
  0x11   :  { %1231 = vmatmul.msk.bf16.vlgmr.msra.gmra.mxu3 %vm129_vm0, %v110_v46  ;;  %v108_v53 = vpack.c.bf16 %v84_v52, %v83_v51  ;;  %v111_v58 = vpack.c.bf16 %v90_v57, %v89_v56  ;;  %v92_v4 = vmax.f32 %v60_v2, 0.0  ;;  %v61_v14 = vld [vmem:[#allocation2 + $0xc0] sm:$0xff]  ;;  %v63_v26 = vld [vmem:[#allocation2 + $0xd0] sm:$0xff]  ;;  %v64_v27 = vld [vmem:[#allocation2 + $0xd8] sm:$0xff] }
  0x12   :  { %385 = vmatpush.bf16.msra.mxu1 %v1308_v33  ;;  %1314 = vmatpush.bf16.msra.mxu2 %v1308_v33  ;;  %v109_v63 = vpack.c.bf16 %v86_v62, %v85_v61  ;;  %v93_v16 = vmax.f32 %v61_v14, 0.0  ;;  %v95_v28 = vmax.f32 %v63_v26, 0.0  ;;  %v96_v29 = vmax.f32 %v64_v27, 0.0  ;;  %v65_v38 = vld [vmem:[#allocation2 + $0xe0] sm:$0xff]  ;;  %v68_v51 = vld [vmem:[#allocation2 + $0xf8] sm:$0xff] }
  0x13   :  { %v112_v6 = vpack.c.bf16 %v92_v4, %v91_v3 }
  0x14   :  { %v114_v30 = vpack.c.bf16 %v96_v29, %v95_v28 }
  0x16   :  { %386 = vmatpush.bf16.msra.mxu1 %v1307_v36  ;;  %1315 = vmatpush.bf16.msra.mxu2 %v1307_v36 }
  0x1a   :  { %387 = vmatpush.bf16.msra.mxu1 %v1306_v39  ;;  %1316 = vmatpush.bf16.msra.mxu2 %v1306_v39  ;;  %v66_v39 = vld [vmem:[#allocation2 + $0xe8] sm:$0xff] }
  0x1b   :  { %1223 = vmatmul.msk.bf16.gmra.mxu0 %vm129_vm0, %v102_v10  ;;  %v98_v41 = vmax.f32 %v66_v39, 0.0 }
  0x1e   :  { %388 = vmatpush.bf16.msra.mxu1 %v1305_v45  ;;  %1317 = vmatpush.bf16.msra.mxu2 %v1305_v45 }
  0x21   :  { %1232 = vmatmul.msk.bf16.gmra.mxu3 %vm129_vm0, %v111_v58 }
  0x22   :  { %389 = vmatpush.bf16.msra.mxu1 %v1304_v47  ;;  %1318 = vmatpush.bf16.msra.mxu2 %v1304_v47 }
  0x26   :  { %390 = vmatpush.bf16.msra.mxu1 %v1303_v50  ;;  %1319 = vmatpush.bf16.msra.mxu2 %v1303_v50  ;;  %v67_v50 = vld [vmem:[#allocation2 + $0xf0] sm:$0xff] }
  0x27   :  { %v99_v52 = vmax.f32 %v67_v50, 0.0 }
  0x2b   :  { %1224 = vmatmul.msk.bf16.gmra.mxu0 %vm129_vm0, %v103_v15  ;;  %v62_v15 = vld [vmem:[#allocation2 + $0xc8] sm:$0xff] }
  0x2c   :  { %v94_v17 = vmax.f32 %v62_v15, 0.0 }
  0x2e   :  { %v113_v18 = vpack.c.bf16 %v94_v17, %v93_v16 }
  0x31   :  { %1233 = vmatmul.msk.bf16.gmra.mxu3 %vm129_vm0, %v112_v6 }
  0x3b   :  { %1225 = vmatmul.msk.bf16.gmra.mxu0 %vm129_vm0, %v104_v20 }
  0x41   :  { %1234 = vmatmul.msk.bf16.gmra.mxu3 %vm129_vm0, %v113_v18 }
  0x4b   :  { %1226 = vmatmul.msk.bf16.gmra.mxu0 %vm129_vm0, %v105_v25 }
  0x51   :  { %1235 = vmatmul.msk.bf16.gmra.mxu3 %vm129_vm0, %v114_v30 }
  0x5b   :  { %1227 = vmatmul.msk.bf16.gmra.mxu0 %vm129_vm0, %v106_v31 }
  0x6b   :  { %1228 = vmatmul.msk.bf16.gmra.mxu0 %vm129_vm0, %v107_v40  ;;  %v97_v40 = vmax.f32 %v65_v38, 0.0  ;;  %v1669_v38 = vld [vmem:[%s2203_s4] ss:$0 sm:$0xff] }
  0x6d   :  { %v115_v42 = vpack.c.bf16 %v98_v41, %v97_v40 }
  0x6f   :  { %1236 = vmatmul.msk.bf16.gmra.mxu3 %vm129_vm0, %v115_v42 }
  0x7b   :  { %1229 = vmatmul.msk.bf16.gmra.mxu0 %vm129_vm0, %v108_v53  ;;  %v100_v53 = vmax.f32 %v68_v51, 0.0 }
  0x7d   :  { %v116_v54 = vpack.c.bf16 %v100_v53, %v99_v52 }
  0x7f   :  { %1237 = vmatmul.msk.bf16.gmra.mxu3 %vm129_vm0, %v116_v54 }
  0x88   :  { %v187_v0 = vpop.f32.mrf.mxu0 }
  0x89   :  { %v1561_v7 = vadd.f32 %v1556_v5, %v187_v0 }
  0x8b   :  { %1230 = vmatmul.msk.bf16.gmra.mxu0 %vm129_vm0, %v109_v63  ;;  %v267_v10 = vmax.f32 %v1561_v7, 0.0 }
  0x90   :  { %v189_v8 = vpop.f32.mrf.mxu0 }
  0x91   :  { %v1564_v9 = vadd.f32 %v1556_v5, %v189_v8 }
  0x93   :  { %v268_v11 = vmax.f32 %v1564_v9, 0.0 }
  0x94   :  { %v232_v16 = vpop.f32.mrf.mxu3 }
  0x95   :  { %v299_v12 = vpack.c.bf16 %v268_v11, %v267_v10  ;;  %v1679_v51 = vadd.f32 %v1556_v5, %v232_v16 }
  0x97   :  { %391 = vmatmul.bf16.vlgmr.msra.gmra.mxu1 %v299_v12 }
  0x98   :  { %v192_v13 = vpop.f32.mrf.mxu0 }
  0x99   :  { %v1574_v19 = vadd.f32 %v1556_v5, %v192_v13 }
  0x9b   :  { %v269_v22 = vmax.f32 %v1574_v19, 0.0 }
  0xa0   :  { %v194_v20 = vpop.f32.mrf.mxu0 }
  0xa1   :  { %v1577_v21 = vadd.f32 %v1556_v5, %v194_v20 }
  0xa3   :  { %v270_v23 = vmax.f32 %v1577_v21, 0.0 }
  0xa5   :  { %v300_v24 = vpack.c.bf16 %v270_v23, %v269_v22 }
  0xa7   :  { %396 = vmatmul.bf16.gmra.mxu1 %v300_v24 }
  0xa8   :  { %v197_v25 = vpop.f32.mrf.mxu0 }
  0xa9   :  { %v1587_v31 = vadd.f32 %v1556_v5, %v197_v25  ;;  %v234_v25 = vpop.f32.mrf.mxu3 }
  0xaa   :  { %v1682_v52 = vadd.f32 %v1556_v5, %v234_v25  ;;  %v1080_v25 = vlaneseq }
  0xab   :  { %v271_v34 = vmax.f32 %v1587_v31, 0.0 }
  0xb0   :  { %v199_v32 = vpop.f32.mrf.mxu0 }
  0xb1   :  { %v1590_v33 = vadd.f32 %v1556_v5, %v199_v32  ;;  %v237_v30 = vpop.f32.mrf.mxu3 }
  0xb3   :  { %v272_v35 = vmax.f32 %v1590_v33, 0.0 }
  0xb5   :  { %v301_v36 = vpack.c.bf16 %v272_v35, %v271_v34 }
  0xb7   :  { %401 = vmatmul.bf16.gmra.mxu1 %v301_v36 }
  0xb8   :  { %v202_v37 = vpop.f32.mrf.mxu0 }
  0xb9   :  { %v1600_v43 = vadd.f32 %v1556_v5, %v202_v37 }
  0xbb   :  { %v273_v46 = vmax.f32 %v1600_v43, 0.0 }
  0xc0   :  { %v204_v44 = vpop.f32.mrf.mxu0 }
  0xc1   :  { %v1603_v45 = vadd.f32 %v1556_v5, %v204_v44 }
  0xc3   :  { %v274_v47 = vmax.f32 %v1603_v45, 0.0 }
  0xc5   :  { %v302_v48 = vpack.c.bf16 %v274_v47, %v273_v46 }
  0xc7   :  { %406 = vmatmul.bf16.gmra.mxu1 %v302_v48  ;;  %v239_v48 = vpop.f32.mrf.mxu3 }
  0xc8   :  { %v207_v49 = vpop.f32.mrf.mxu0 }
  0xc9   :  { %v1613_v55 = vadd.f32 %v1556_v5, %v207_v49 }
  0xcb   :  { %v275_v58 = vmax.f32 %v1613_v55, 0.0 }
  0xd0   :  { %v209_v56 = vpop.f32.mrf.mxu0 }
  0xd1   :  { %v1616_v57 = vadd.f32 %v1556_v5, %v209_v56 }
  0xd3   :  { %v276_v59 = vmax.f32 %v1616_v57, 0.0 }
  0xd5   :  { %v303_v60 = vpack.c.bf16 %v276_v59, %v275_v58 }
  0xd7   :  { %411 = vmatmul.bf16.gmra.mxu1 %v303_v60  ;;  %v1685_v60 = vpop.f32.mrf.mxu3 }
  0xd8   :  { %v212_v61 = vpop.f32.mrf.mxu0 }
  0xd9   :  { %v1625_v62 = vadd.f32 %v1556_v5, %v212_v61 }
  0xdb   :  { %v277_v1 = vmax.f32 %v1625_v62, 0.0 }
  0xe0   :  { %v214_v63 = vpop.f32.mrf.mxu0 }
  0xe1   :  { %v1628_v0 = vadd.f32 %v1556_v5, %v214_v63  ;;  %v2208_v63 = vmax.f32 %v1679_v51, 0.0 }
  0xe3   :  { %v278_v2 = vmax.f32 %v1628_v0, 0.0 }
  0xe5   :  { %v304_v3 = vpack.c.bf16 %v278_v2, %v277_v1 }
  0xe7   :  { %416 = vmatmul.bf16.gmra.mxu1 %v304_v3  ;;  %v2205_v3 = vmax.f32 %v1682_v52, 0.0 }
  0xe8   :  { %v217_v4 = vpop.f32.mrf.mxu0 }
  0xe9   :  { %v1637_v6 = vadd.f32 %v1556_v5, %v217_v4 }
  0xeb   :  { %v279_v13 = vmax.f32 %v1637_v6, 0.0 }
  0xf0   :  { %v219_v8 = vpop.f32.mrf.mxu0 }
  0xf1   :  { %v1640_v12 = vadd.f32 %v1556_v5, %v219_v8 }
  0xf3   :  { %v280_v14 = vmax.f32 %v1640_v12, 0.0 }
  0xf5   :  { %v305_v15 = vpack.c.bf16 %v280_v14, %v279_v13 }
  0xf7   :  { %421 = vmatmul.bf16.gmra.mxu1 %v305_v15  ;;  %v308_v15 = vpack.c.bf16 %v2205_v3, %v2208_v63 }
  0xf8   :  { %v222_v17 = vpop.f32.mrf.mxu0 }
  0xf9   :  { %v1649_v18 = vadd.f32 %v1556_v5, %v222_v17 }
  0xfb   :  { %v281_v26 = vmax.f32 %v1649_v18, 0.0 }
 0x100   :  { %v224_v20 = vpop.f32.mrf.mxu0 }
 0x101   :  { %v1652_v24 = vadd.f32 %v1556_v5, %v224_v20 }
 0x103   :  { %v282_v27 = vmax.f32 %v1652_v24, 0.0 }
 0x105   :  { %v306_v28 = vpack.c.bf16 %v282_v27, %v281_v26 }
 0x107   :  { %426 = vmatmul.bf16.gmra.mxu1 %v306_v28 }
 0x108   :  { %v227_v29 = vpop.f32.mrf.mxu0 }
 0x109   :  { %v1661_v32 = vadd.f32 %v1556_v5, %v227_v29 }
 0x10b   :  { %v283_v39 = vmax.f32 %v1661_v32, 0.0 }
 0x110   :  { %v229_v36 = vpop.f32.mrf.mxu0 }
 0x111   :  { %v1664_v37 = vadd.f32 %v1556_v5, %v229_v36  ;;  %v1694_v36 = vpop.f32.mrf.mxu3 }
 0x113   :  { %v284_v40 = vmax.f32 %v1664_v37, 0.0 }
 0x114   :  { %v392_v41 = vpop.f32.mrf.mxu1 }
 0x115   :  { %v393_v42 = vadd.f32 %v1669_v38, %v392_v41  ;;  %v307_v44 = vpack.c.bf16 %v284_v40, %v283_v39  ;;  %v1697_v41 = vadd.f32 %v1556_v5, %v237_v30 }
 0x117   :  { %v1270_v49 = vmul.f32 -1.442695, %v393_v42  ;;  %431 = vmatmul.bf16.vlgmr.msra.gmra.mxu2 %v307_v44  ;;  %v1700_v44 = vadd.f32 %v1556_v5, %v239_v48 }
 0x119   :  { %1325 = vpow2.f32 %v1270_v49  ;;  %v2206_v30 = vmax.f32 %v1700_v44, 0.0 }
 0x11c   :  { %v394_v50 = vpop.f32.mrf.mxu1 }
 0x11d   :  { %v395_v53 = vadd.f32 %v1669_v38, %v394_v50  ;;  %v1702_v50 = vand.u32 127, %v1080_v25 }
 0x11f   :  { %v1326_v54 = vpop.eup %1325  ;;  %v1271_v56 = vmul.f32 -1.442695, %v395_v53  ;;  %vm1083_vm4 = vcmp.lt.s32.totalorder %v1702_v50, 9  ;;  %vm1084_vm5 = vcmp.lt.s32.totalorder %v1702_v50, 11  ;;  %vm1082_vm7 = vcmp.eq.s32.totalorder %v1702_v50, 0 }
 0x120   :  { %v568_v61 = vadd.f32 1.0, %v1326_v54 }
 0x121   :  { %1327 = vpow2.f32 %v1271_v56 }
 0x122   :  { %1329 = vrcp.f32 %v568_v61  ;;  %v611_v49 = vand.u32 2147483648, %v568_v61  ;;  %v609_v56 = vand.u32 2147483647, %v568_v61  ;;  %vm605_vm2 = vweird.f32 %v568_v61 }
 0x124   :  { %v397_v4 = vpop.f32.mrf.mxu1  ;;  %v612_v48 = vor.u32 1.1754944e-38, %v611_v49  ;;  %vm610_vm6 = vcmp.eq.f32.partialorder %v609_v56, 8.507059e+37 }
 0x125   :  { %v398_v8 = vadd.f32 %v1669_v38, %v397_v4 }
 0x127   :  { %v1328_v16 = vpop.eup %1327  ;;  %v1272_v17 = vmul.f32 -1.442695, %v398_v8  ;;  %436 = vmatmul.bf16.gmra.mxu2 %v308_v15  ;;  %v2207_v8 = vmax.f32 %v1697_v41, 0.0 }
 0x128   :  { %v1330_v20 = vpop.eup %1329  ;;  %v569_v28 = vadd.f32 1.0, %v1328_v16 }
 0x129   :  { %v601_v29 = vmul.f32 %v1330_v20, %v568_v61  ;;  %1331 = vpow2.f32 %v1272_v17  ;;  %vm606_vm1 = vweird.f32 %v1330_v20 }
 0x12a   :  { %1333 = vrcp.f32 %v569_v28  ;;  %vm607_vm3 = vmor %vm605_vm2, %vm606_vm1  ;;  %vm620_vm9 = vweird.f32 %v569_v28 }
 0x12b   :  { %v602_v42 = vsub.f32 1.0, %v601_v29 }
 0x12c   :  { %v399_v53 = vpop.f32.mrf.mxu1 }
 0x12d   :  { %v603_v54 = vmul.f32 %v1330_v20, %v602_v42  ;;  %v400_v4 = vadd.f32 %v1669_v38, %v399_v53 }
 0x12f   :  { %v1332_v15 = vpop.eup %1331  ;;  %v604_v16 = vadd.f32 %v1330_v20, %v603_v54  ;;  %v1273_v17 = vmul.f32 -1.442695, %v400_v4  ;;  %v1712_v4 = vpop.f32.mrf.mxu3 }
 0x130   :  { %v1334_v29 = vpop.eup %1333  ;;  %v570_v25 = vadd.f32 1.0, %v1332_v15  ;;  %v624_v15 = vand.u32 2147483647, %v569_v28 }
 0x131   :  { %v608_v42 = vsel %vm607_vm3, %v1330_v20, %v604_v16  ;;  %v616_v3 = vmul.f32 %v1334_v29, %v569_v28  ;;  %1335 = vpow2.f32 %v1273_v17  ;;  %v626_v20 = vand.u32 2147483648, %v569_v28 }
 0x132   :  { %v613_v53 = vsel %vm610_vm6, %v612_v48, %v608_v42  ;;  %1337 = vrcp.f32 %v570_v25  ;;  %v309_v16 = vpack.c.bf16 %v2206_v30, %v2207_v8  ;;  %vm621_vm8 = vweird.f32 %v1334_v29 }
 0x133   :  { %v1085_v61 = vsel %vm1084_vm5, %v613_v53, 0.0  ;;  %v617_v54 = vsub.f32 1.0, %v616_v3  ;;  %vm622_vm10 = vmor %vm620_vm9, %vm621_vm8  ;;  %v627_v30 = vor.u32 1.1754944e-38, %v626_v20  ;;  %vm625_vm11 = vcmp.eq.f32.partialorder %v624_v15, 8.507059e+37 }
 0x134   :  { %v1117_v49 = vsel %vm1083_vm4, %v267_v10, %v1085_v61  ;;  %v402_v56 = vpop.f32.mrf.mxu1  ;;  %v639_v20 = vand.u32 2147483647, %v570_v25  ;;  %v1741_v15 = vadd.f32 %v1556_v5, %v1694_v36  ;;  %vm635_vm13 = vweird.f32 %v570_v25 }
 0x135   :  { %v1149_v17 = vsel %vm1082_vm7, %v1561_v7, %v1117_v49  ;;  %v618_v3 = vmul.f32 %v1334_v29, %v617_v54  ;;  %v403_v48 = vadd.f32 %v1669_v38, %v402_v56 }
 0x136   :  { %1181 = vst [vmem:[%s2204_s5] sm:$0xff] %v1149_v17  ;;  %v1733_v17 = vadd.f32 %v1556_v5, %v1685_v60  ;;  %vm640_vm15 = vcmp.eq.f32.partialorder %v639_v20, 8.507059e+37 }
 0x137   :  { %v1336_v10 = vpop.eup %1335  ;;  %v619_v42 = vadd.f32 %v1334_v29, %v618_v3  ;;  %v1274_v53 = vmul.f32 -1.442695, %v403_v48  ;;  %441 = vmatmul.bf16.gmra.mxu2 %v309_v16  ;;  %v249_v3 = vpop.f32.mrf.mxu3 }
 0x138   :  { %v1338_v61 = vpop.eup %1337  ;;  %v571_v8 = vadd.f32 1.0, %v1336_v10 }
 0x139   :  { %v623_v63 = vsel %vm622_vm10, %v1334_v29, %v619_v42  ;;  %v631_v7 = vmul.f32 %v1338_v61, %v570_v25  ;;  %1339 = vpow2.f32 %v1274_v53  ;;  %v641_v29 = vand.u32 2147483648, %v570_v25 }
 0x13a   :  { %v628_v54 = vsel %vm625_vm11, %v627_v30, %v623_v63  ;;  %1341 = vrcp.f32 %v571_v8  ;;  %vm636_vm12 = vweird.f32 %v1338_v61  ;;  %v289_v53 = vmax.f32 %v1733_v17, 0.0 }
 0x13b   :  { %v1086_v49 = vsel %vm1084_vm5, %v628_v54, 0.0  ;;  %v632_v56 = vsub.f32 1.0, %v631_v7  ;;  %vm637_vm14 = vmor %vm635_vm13, %vm636_vm12  ;;  %v642_v42 = vor.u32 1.1754944e-38, %v641_v29  ;;  %v654_v29 = vand.u32 2147483647, %v571_v8 }
 0x13c   :  { %v1118_v28 = vsel %vm1083_vm4, %v268_v11, %v1086_v49  ;;  %v404_v63 = vpop.f32.mrf.mxu1  ;;  %vm650_vm1 = vweird.f32 %v571_v8 }
 0x13d   :  { %v1150_v30 = vsel %vm1082_vm7, %v1564_v9, %v1118_v28  ;;  %v633_v16 = vmul.f32 %v1338_v61, %v632_v56  ;;  %v405_v60 = vadd.f32 %v1669_v38, %v404_v63  ;;  %v290_v9 = vmax.f32 %v1741_v15, 0.0 }
 0x13e   :  { %1182 = vst [vmem:[%s2204_s5 + $0x8] sm:$0xff] %v1150_v30  ;;  %v656_v30 = vand.u32 2147483648, %v571_v8  ;;  %vm655_vm3 = vcmp.eq.f32.partialorder %v654_v29, 8.507059e+37  ;;  %v1782_v29 = vadd.f32 %v1556_v5, %v249_v3 }
 0x13f   :  { %v1340_v11 = vpop.eup %1339  ;;  %v634_v48 = vadd.f32 %v1338_v61, %v633_v16  ;;  %v1275_v10 = vmul.f32 -1.442695, %v405_v60 }
 0x140   :  { %v1342_v36 = vpop.eup %1341  ;;  %v572_v7 = vadd.f32 1.0, %v1340_v11 }
 0x141   :  { %v638_v54 = vsel %vm637_vm14, %v1338_v61, %v634_v48  ;;  %v646_v49 = vmul.f32 %v1342_v36, %v571_v8  ;;  %1343 = vpow2.f32 %v1275_v10  ;;  %v310_v61 = vpack.c.bf16 %v290_v9, %v289_v53 }
 0x142   :  { %v643_v56 = vsel %vm640_vm15, %v642_v42, %v638_v54  ;;  %1345 = vrcp.f32 %v572_v7  ;;  %vm651_vm0 = vweird.f32 %v1342_v36  ;;  %v1769_v42 = vpop.f32.mrf.mxu3  ;;  %v1775_v8 = vadd.f32 %v1556_v5, %v1712_v4 }
 0x143   :  { %v1087_v28 = vsel %vm1084_vm5, %v643_v56, 0.0  ;;  %v647_v63 = vsub.f32 1.0, %v646_v49  ;;  %vm652_vm2 = vmor %vm650_vm1, %vm651_vm0  ;;  %v657_v49 = vor.u32 1.1754944e-38, %v656_v30  ;;  %vm665_vm8 = vweird.f32 %v572_v7 }
 0x144   :  { %v1119_v25 = vsel %vm1083_vm4, %v269_v22, %v1087_v28  ;;  %v407_v16 = vpop.f32.mrf.mxu1 }
 0x145   :  { %v1151_v20 = vsel %vm1082_vm7, %v1574_v19, %v1119_v25  ;;  %v648_v60 = vmul.f32 %v1342_v36, %v647_v63  ;;  %v408_v11 = vadd.f32 %v1669_v38, %v407_v16 }
 0x146   :  { %1183 = vst [vmem:[%s2204_s5 + $0x10] sm:$0xff] %v1151_v20 }
 0x147   :  { %v1344_v22 = vpop.eup %1343  ;;  %v649_v48 = vadd.f32 %v1342_v36, %v648_v60  ;;  %v1276_v10 = vmul.f32 -1.442695, %v408_v11  ;;  %446 = vmatmul.bf16.gmra.mxu2 %v310_v61  ;;  %v669_v61 = vand.u32 2147483647, %v572_v7 }
 0x148   :  { %v1346_v54 = vpop.eup %1345  ;;  %v573_v56 = vadd.f32 1.0, %v1344_v22 }
 0x149   :  { %v653_v19 = vsel %vm652_vm2, %v1342_v36, %v649_v48  ;;  %v661_v28 = vmul.f32 %v1346_v54, %v572_v7  ;;  %1347 = vpow2.f32 %v1276_v10  ;;  %v671_v36 = vand.u32 2147483648, %v572_v7 }
 0x14a   :  { %v658_v63 = vsel %vm655_vm3, %v657_v49, %v653_v19  ;;  %1349 = vrcp.f32 %v573_v56  ;;  %vm666_vm6 = vweird.f32 %v1346_v54  ;;  %v291_v49 = vmax.f32 %v1775_v8, 0.0 }
 0x14b   :  { %v1088_v25 = vsel %vm1084_vm5, %v658_v63, 0.0  ;;  %v662_v16 = vsub.f32 1.0, %v661_v28  ;;  %vm667_vm9 = vmor %vm665_vm8, %vm666_vm6  ;;  %v672_v3 = vor.u32 1.1754944e-38, %v671_v36  ;;  %vm670_vm10 = vcmp.eq.f32.partialorder %v669_v61, 8.507059e+37 }
 0x14c   :  { %v1120_v30 = vsel %vm1083_vm4, %v270_v23, %v1088_v25  ;;  %v409_v20 = vpop.f32.mrf.mxu1  ;;  %v254_v25 = vpop.f32.mrf.mxu3  ;;  %vm680_vm12 = vweird.f32 %v573_v56 }
 0x14d   :  { %v1152_v60 = vsel %vm1082_vm7, %v1577_v21, %v1120_v30  ;;  %v663_v11 = vmul.f32 %v1346_v54, %v662_v16  ;;  %v410_v4 = vadd.f32 %v1669_v38, %v409_v20  ;;  %v292_v21 = vmax.f32 %v1782_v29, 0.0 }
 0x14e   :  { %1184 = vst [vmem:[%s2204_s5 + $0x18] sm:$0xff] %v1152_v60  ;;  %v684_v20 = vand.u32 2147483647, %v573_v56  ;;  %v686_v60 = vand.u32 2147483648, %v573_v56 }
 0x14f   :  { %v1348_v22 = vpop.eup %1347  ;;  %v664_v23 = vadd.f32 %v1346_v54, %v663_v11  ;;  %v1277_v48 = vmul.f32 -1.442695, %v410_v4 }
 0x150   :  { %v1350_v10 = vpop.eup %1349  ;;  %v574_v19 = vadd.f32 1.0, %v1348_v22  ;;  %vm685_vm14 = vcmp.eq.f32.partialorder %v684_v20, 8.507059e+37 }
 0x151   :  { %v668_v28 = vsel %vm667_vm9, %v1346_v54, %v664_v23  ;;  %v676_v63 = vmul.f32 %v1350_v10, %v573_v56  ;;  %1351 = vpow2.f32 %v1277_v48  ;;  %v311_v54 = vpack.c.bf16 %v292_v21, %v291_v49 }
 0x152   :  { %v673_v16 = vsel %vm670_vm10, %v672_v3, %v668_v28  ;;  %1353 = vrcp.f32 %v574_v19  ;;  %vm681_vm11 = vweird.f32 %v1350_v10  ;;  %v687_v28 = vor.u32 1.1754944e-38, %v686_v60 }
 0x153   :  { %v1089_v30 = vsel %vm1084_vm5, %v673_v16, 0.0  ;;  %v677_v7 = vsub.f32 1.0, %v676_v63  ;;  %vm682_vm13 = vmor %vm680_vm12, %vm681_vm11  ;;  %v701_v20 = vand.u32 2147483648, %v574_v19  ;;  %vm695_vm0 = vweird.f32 %v574_v19 }
 0x154   :  { %v1121_v36 = vsel %vm1083_vm4, %v271_v34, %v1089_v30  ;;  %v412_v11 = vpop.f32.mrf.mxu1  ;;  %v257_v56 = vpop.f32.mrf.mxu3 }
 0x155   :  { %v1153_v61 = vsel %vm1082_vm7, %v1587_v31, %v1121_v36  ;;  %v678_v4 = vmul.f32 %v1350_v10, %v677_v7  ;;  %v413_v22 = vadd.f32 %v1669_v38, %v412_v11  ;;  %v1814_v11 = vadd.f32 %v1556_v5, %v1769_v42 }
 0x156   :  { %1185 = vst [vmem:[%s2204_s5 + $0x20] sm:$0xff] %v1153_v61 }
 0x157   :  { %v1352_v34 = vpop.eup %1351  ;;  %v679_v23 = vadd.f32 %v1350_v10, %v678_v4  ;;  %v1278_v48 = vmul.f32 -1.442695, %v413_v22  ;;  %451 = vmatmul.bf16.gmra.mxu2 %v311_v54  ;;  %v1821_v54 = vadd.f32 %v1556_v5, %v254_v25  ;;  %v702_v25 = vor.u32 1.1754944e-38, %v701_v20 }
 0x158   :  { %v1354_v3 = vpop.eup %1353  ;;  %v575_v63 = vadd.f32 1.0, %v1352_v34 }
 0x159   :  { %v683_v16 = vsel %vm682_vm13, %v1350_v10, %v679_v23  ;;  %v691_v31 = vmul.f32 %v1354_v3, %v574_v19  ;;  %1355 = vpow2.f32 %v1278_v48  ;;  %v699_v10 = vand.u32 2147483647, %v574_v19 }
 0x15a   :  { %v688_v30 = vsel %vm685_vm14, %v687_v28, %v683_v16  ;;  %1357 = vrcp.f32 %v575_v63  ;;  %vm696_vm15 = vweird.f32 %v1354_v3  ;;  %v293_v28 = vmax.f32 %v1814_v11, 0.0 }
 0x15b   :  { %v1090_v7 = vsel %vm1084_vm5, %v688_v30, 0.0  ;;  %v692_v36 = vsub.f32 1.0, %v691_v31  ;;  %vm697_vm1 = vmor %vm695_vm0, %vm696_vm15  ;;  %vm700_vm2 = vcmp.eq.f32.partialorder %v699_v10, 8.507059e+37  ;;  %v714_v20 = vand.u32 2147483647, %v575_v63 }
 0x15c   :  { %v1122_v60 = vsel %vm1083_vm4, %v272_v35, %v1090_v7  ;;  %v414_v61 = vpop.f32.mrf.mxu1  ;;  %vm710_vm6 = vweird.f32 %v575_v63 }
 0x15d   :  { %v1154_v4 = vsel %vm1082_vm7, %v1590_v33, %v1122_v60  ;;  %v693_v22 = vmul.f32 %v1354_v3, %v692_v36  ;;  %v415_v42 = vadd.f32 %v1669_v38, %v414_v61  ;;  %v294_v33 = vmax.f32 %v1821_v54, 0.0 }
 0x15e   :  { %1186 = vst [vmem:[%s2204_s5 + $0x28] sm:$0xff] %v1154_v4  ;;  %v716_v61 = vand.u32 2147483648, %v575_v63  ;;  %vm715_vm9 = vcmp.eq.f32.partialorder %v714_v20, 8.507059e+37 }
 0x15f   :  { %v1356_v34 = vpop.eup %1355  ;;  %v694_v35 = vadd.f32 %v1354_v3, %v693_v22  ;;  %v1279_v23 = vmul.f32 -1.442695, %v415_v42 }
 0x160   :  { %v1358_v48 = vpop.eup %1357  ;;  %v576_v16 = vadd.f32 1.0, %v1356_v34  ;;  %v259_v34 = vpop.f32.mrf.mxu3 }
 0x161   :  { %v698_v31 = vsel %vm697_vm1, %v1354_v3, %v694_v35  ;;  %v706_v30 = vmul.f32 %v1358_v48, %v575_v63  ;;  %1359 = vpow2.f32 %v1279_v23  ;;  %v312_v3 = vpack.c.bf16 %v294_v33, %v293_v28 }
 0x162   :  { %v703_v7 = vsel %vm700_vm2, %v702_v25, %v698_v31  ;;  %1361 = vrcp.f32 %v576_v16  ;;  %vm711_vm3 = vweird.f32 %v1358_v48  ;;  %v717_v31 = vor.u32 1.1754944e-38, %v716_v61 }
 0x163   :  { %v1091_v36 = vsel %vm1084_vm5, %v703_v7, 0.0  ;;  %v707_v60 = vsub.f32 1.0, %v706_v30  ;;  %vm712_vm8 = vmor %vm710_vm6, %vm711_vm3  ;;  %v729_v61 = vand.u32 2147483647, %v576_v16  ;;  %vm725_vm11 = vweird.f32 %v576_v16 }
 0x164   :  { %v1123_v19 = vsel %vm1083_vm4, %v273_v46, %v1091_v36  ;;  %v417_v4 = vpop.f32.mrf.mxu1 }
 0x165   :  { %v1155_v10 = vsel %vm1082_vm7, %v1600_v43, %v1123_v19  ;;  %v708_v22 = vmul.f32 %v1358_v48, %v707_v60  ;;  %v418_v42 = vadd.f32 %v1669_v38, %v417_v4  ;;  %v1852_v4 = vadd.f32 %v1556_v5, %v257_v56 }
 0x166   :  { %1187 = vst [vmem:[%s2204_s5 + $0x30] sm:$0xff] %v1155_v10  ;;  %vm730_vm13 = vcmp.eq.f32.partialorder %v729_v61, 8.507059e+37 }
 0x167   :  { %v1360_v46 = vpop.eup %1359  ;;  %v709_v35 = vadd.f32 %v1358_v48, %v708_v22  ;;  %v1280_v23 = vmul.f32 -1.442695, %v418_v42  ;;  %456 = vmatmul.bf16.gmra.mxu2 %v312_v3  ;;  %v731_v3 = vand.u32 2147483648, %v576_v16 }
 0x168   :  { %v1362_v25 = vpop.eup %1361  ;;  %v577_v30 = vadd.f32 1.0, %v1360_v46 }
 0x169   :  { %v713_v7 = vsel %vm712_vm8, %v1358_v48, %v709_v35  ;;  %v721_v43 = vmul.f32 %v1362_v25, %v576_v16  ;;  %1363 = vpow2.f32 %v1280_v23  ;;  %v1859_v48 = vadd.f32 %v1556_v5, %v259_v34  ;;  %v262_v35 = vpop.f32.mrf.mxu3 }
 0x16a   :  { %v718_v36 = vsel %vm715_vm9, %v717_v31, %v713_v7  ;;  %1365 = vrcp.f32 %v577_v30  ;;  %vm726_vm10 = vweird.f32 %v1362_v25  ;;  %v732_v23 = vor.u32 1.1754944e-38, %v731_v3 }
 0x16b   :  { %v1092_v60 = vsel %vm1084_vm5, %v718_v36, 0.0  ;;  %v722_v19 = vsub.f32 1.0, %v721_v43  ;;  %vm727_vm12 = vmor %vm725_vm11, %vm726_vm10  ;;  %v295_v31 = vmax.f32 %v1852_v4, 0.0  ;;  %v744_v3 = vand.u32 2147483647, %v577_v30 }
 0x16c   :  { %v1124_v63 = vsel %vm1083_vm4, %v274_v47, %v1092_v60  ;;  %v419_v20 = vpop.f32.mrf.mxu1  ;;  %vm740_vm15 = vweird.f32 %v577_v30 }
 0x16d   :  { %v1156_v10 = vsel %vm1082_vm7, %v1603_v45, %v1124_v63  ;;  %v723_v22 = vmul.f32 %v1362_v25, %v722_v19  ;;  %v420_v56 = vadd.f32 %v1669_v38, %v419_v20  ;;  %v296_v45 = vmax.f32 %v1859_v48, 0.0 }
 0x16e   :  { %1188 = vst [vmem:[%s2204_s5 + $0x38] sm:$0xff] %v1156_v10  ;;  %v746_v20 = vand.u32 2147483648, %v577_v30  ;;  %vm745_vm1 = vcmp.eq.f32.partialorder %v744_v3, 8.507059e+37 }
 0x16f   :  { %v1364_v42 = vpop.eup %1363  ;;  %v724_v47 = vadd.f32 %v1362_v25, %v723_v22  ;;  %v1281_v46 = vmul.f32 -1.442695, %v420_v56 }
 0x170   :  { %v1366_v34 = vpop.eup %1365  ;;  %v578_v7 = vadd.f32 1.0, %v1364_v42 }
 0x171   :  { %v728_v43 = vsel %vm727_vm12, %v1362_v25, %v724_v47  ;;  %v736_v36 = vmul.f32 %v1366_v34, %v577_v30  ;;  %1367 = vpow2.f32 %v1281_v46  ;;  %v313_v25 = vpack.c.bf16 %v296_v45, %v295_v31 }
 0x172   :  { %v733_v60 = vsel %vm730_vm13, %v732_v23, %v728_v43  ;;  %1369 = vrcp.f32 %v578_v7  ;;  %vm741_vm14 = vweird.f32 %v1366_v34  ;;  %v747_v23 = vor.u32 1.1754944e-38, %v746_v20 }
 0x173   :  { %v1093_v19 = vsel %vm1084_vm5, %v733_v60, 0.0  ;;  %v737_v16 = vsub.f32 1.0, %v736_v36  ;;  %vm742_vm0 = vmor %vm740_vm15, %vm741_vm14  ;;  %v264_v60 = vpop.f32.mrf.mxu3  ;;  %v759_v20 = vand.u32 2147483647, %v578_v7  ;;  %vm755_vm3 = vweird.f32 %v578_v7 }
 0x174   :  { %v1125_v63 = vsel %vm1083_vm4, %v275_v58, %v1093_v19  ;;  %v422_v10 = vpop.f32.mrf.mxu1  ;;  %v1897_v3 = vadd.f32 %v1556_v5, %v264_v60 }
 0x175   :  { %v1157_v61 = vsel %vm1082_vm7, %v1613_v55, %v1125_v63  ;;  %v738_v22 = vmul.f32 %v1366_v34, %v737_v16  ;;  %v423_v56 = vadd.f32 %v1669_v38, %v422_v10  ;;  %v1890_v10 = vadd.f32 %v1556_v5, %v262_v35 }
 0x176   :  { %1189 = vst [vmem:[%s2204_s5 + $0x40] sm:$0xff] %v1157_v61  ;;  %vm760_vm8 = vcmp.eq.f32.partialorder %v759_v20, 8.507059e+37 }
 0x177   :  { %v1368_v58 = vpop.eup %1367  ;;  %v739_v42 = vadd.f32 %v1366_v34, %v738_v22  ;;  %v1282_v47 = vmul.f32 -1.442695, %v423_v56  ;;  %461 = vmatmul.bf16.gmra.mxu2 %v313_v25 }
 0x178   :  { %v1370_v46 = vpop.eup %1369  ;;  %v579_v43 = vadd.f32 1.0, %v1368_v58 }
 0x179   :  { %v743_v36 = vsel %vm742_vm0, %v1366_v34, %v739_v42  ;;  %v751_v55 = vmul.f32 %v1370_v46, %v578_v7  ;;  %1371 = vpow2.f32 %v1282_v47  ;;  %v761_v34 = vand.u32 2147483648, %v578_v7 }
 0x17a   :  { %v748_v19 = vsel %vm745_vm1, %v747_v23, %v743_v36  ;;  %1373 = vrcp.f32 %v579_v43  ;;  %vm756_vm2 = vweird.f32 %v1370_v46  ;;  %v297_v47 = vmax.f32 %v1890_v10, 0.0 }
 0x17b   :  { %v1094_v16 = vsel %vm1084_vm5, %v748_v19, 0.0  ;;  %v752_v63 = vsub.f32 1.0, %v751_v55  ;;  %vm757_vm6 = vmor %vm755_vm3, %vm756_vm2  ;;  %v762_v5 = vor.u32 1.1754944e-38, %v761_v34  ;;  %vm770_vm10 = vweird.f32 %v579_v43 }
 0x17c   :  { %v1126_v30 = vsel %vm1083_vm4, %v276_v59, %v1094_v16  ;;  %v424_v25 = vpop.f32.mrf.mxu1 }
 0x17d   :  { %v1158_v61 = vsel %vm1082_vm7, %v1616_v57, %v1126_v30  ;;  %v753_v22 = vmul.f32 %v1370_v46, %v752_v63  ;;  %v425_v35 = vadd.f32 %v1669_v38, %v424_v25  ;;  %v298_v57 = vmax.f32 %v1897_v3, 0.0 }
 0x17e   :  { %1190 = vst [vmem:[%s2204_s5 + $0x48] sm:$0xff] %v1158_v61  ;;  %v774_v63 = vand.u32 2147483647, %v579_v43  ;;  %v776_v30 = vand.u32 2147483648, %v579_v43 }
 0x17f   :  { %v1372_v56 = vpop.eup %1371  ;;  %v754_v59 = vadd.f32 %v1370_v46, %v753_v22  ;;  %v1283_v58 = vmul.f32 -1.442695, %v425_v35 }
 0x180   :  { %v1374_v42 = vpop.eup %1373  ;;  %v580_v23 = vadd.f32 1.0, %v1372_v56  ;;  %vm775_vm12 = vcmp.eq.f32.partialorder %v774_v63, 8.507059e+37 }
 0x181   :  { %v758_v36 = vsel %vm757_vm6, %v1370_v46, %v754_v59  ;;  %v766_v55 = vmul.f32 %v1374_v42, %v579_v43  ;;  %1375 = vpow2.f32 %v1283_v58  ;;  %v314_v46 = vpack.c.bf16 %v298_v57, %v297_v47 }
 0x182   :  { %v763_v60 = vsel %vm760_vm8, %v762_v5, %v758_v36  ;;  %1377 = vrcp.f32 %v580_v23  ;;  %vm771_vm9 = vweird.f32 %v1374_v42  ;;  %v777_v59 = vor.u32 1.1754944e-38, %v776_v30 }
 0x183   :  { %v1095_v19 = vsel %vm1084_vm5, %v763_v60, 0.0  ;;  %v767_v16 = vsub.f32 1.0, %v766_v55  ;;  %vm772_vm11 = vmor %vm770_vm10, %vm771_vm9  ;;  %vm785_vm14 = vweird.f32 %v580_v23 }
 0x184   :  { %v1127_v7 = vsel %vm1083_vm4, %v277_v1, %v1095_v19  ;;  %v427_v34 = vpop.f32.mrf.mxu1  ;;  %v789_v19 = vand.u32 2147483647, %v580_v23 }
 0x185   :  { %v1159_v20 = vsel %vm1082_vm7, %v1625_v62, %v1127_v7  ;;  %v768_v25 = vmul.f32 %v1374_v42, %v767_v16  ;;  %v428_v61 = vadd.f32 %v1669_v38, %v427_v34  ;;  %v791_v16 = vand.u32 2147483648, %v580_v23 }
 0x186   :  { %1191 = vst [vmem:[%s2204_s5 + $0x50] sm:$0xff] %v1159_v20  ;;  %vm790_vm0 = vcmp.eq.f32.partialorder %v789_v19, 8.507059e+37 }
 0x187   :  { %v1376_v1 = vpop.eup %1375  ;;  %v769_v22 = vadd.f32 %v1374_v42, %v768_v25  ;;  %v1284_v35 = vmul.f32 -1.442695, %v428_v61  ;;  %466 = vmatmul.bf16.gmra.mxu2 %v314_v46  ;;  %v792_v25 = vor.u32 1.1754944e-38, %v791_v16 }
 0x188   :  { %v1378_v56 = vpop.eup %1377  ;;  %v581_v58 = vadd.f32 1.0, %v1376_v1 }
 0x189   :  { %v773_v5 = vsel %vm772_vm11, %v1374_v42, %v769_v22  ;;  %v781_v62 = vmul.f32 %v1378_v56, %v580_v23  ;;  %1379 = vpow2.f32 %v1284_v35  ;;  %vm786_vm13 = vweird.f32 %v1378_v56 }
 0x18a   :  { %v778_v36 = vsel %vm775_vm12, %v777_v59, %v773_v5  ;;  %1381 = vrcp.f32 %v581_v58  ;;  %vm787_vm15 = vmor %vm785_vm14, %vm786_vm13  ;;  %v806_v5 = vand.u32 2147483648, %v581_v58  ;;  %vm800_vm2 = vweird.f32 %v581_v58 }
 0x18b   :  { %v1096_v55 = vsel %vm1084_vm5, %v778_v36, 0.0  ;;  %v782_v60 = vsub.f32 1.0, %v781_v62  ;;  %v804_v36 = vand.u32 2147483647, %v581_v58 }
 0x18c   :  { %v1128_v43 = vsel %vm1083_vm4, %v278_v2, %v1096_v55  ;;  %v429_v7 = vpop.f32.mrf.mxu1  ;;  %v807_v19 = vor.u32 1.1754944e-38, %v806_v5 }
 0x18d   :  { %v1160_v42 = vsel %vm1082_vm7, %v1628_v0, %v1128_v43  ;;  %v783_v63 = vmul.f32 %v1378_v56, %v782_v60  ;;  %v430_v30 = vadd.f32 %v1669_v38, %v429_v7  ;;  %vm805_vm6 = vcmp.eq.f32.partialorder %v804_v36, 8.507059e+37 }
 0x18e   :  { %1192 = vst [vmem:[%s2204_s5 + $0x58] sm:$0xff] %v1160_v42 }
 0x18f   :  { %v1380_v34 = vpop.eup %1379  ;;  %v784_v46 = vadd.f32 %v1378_v56, %v783_v63  ;;  %v1285_v20 = vmul.f32 -1.442695, %v430_v30 }
 0x190   :  { %v1382_v2 = vpop.eup %1381  ;;  %v582_v61 = vadd.f32 1.0, %v1380_v34 }
 0x191   :  { %v788_v1 = vsel %vm787_vm15, %v1378_v56, %v784_v46  ;;  %v796_v22 = vmul.f32 %v1382_v2, %v581_v58  ;;  %1383 = vpow2.f32 %v1285_v20  ;;  %vm801_vm1 = vweird.f32 %v1382_v2 }
 0x192   :  { %v793_v0 = vsel %vm790_vm0, %v792_v25, %v788_v1  ;;  %1385 = vrcp.f32 %v582_v61  ;;  %vm802_vm3 = vmor %vm800_vm2, %vm801_vm1  ;;  %v819_v46 = vand.u32 2147483647, %v582_v61  ;;  %v821_v20 = vand.u32 2147483648, %v582_v61 }
 0x193   :  { %v1097_v35 = vsel %vm1084_vm5, %v793_v0, 0.0  ;;  %v797_v59 = vsub.f32 1.0, %v796_v22  ;;  %vm815_vm9 = vweird.f32 %v582_v61 }
 0x194   :  { %v1129_v23 = vsel %vm1083_vm4, %v279_v13, %v1097_v35  ;;  %v822_v35 = vor.u32 1.1754944e-38, %v821_v20  ;;  %vm820_vm11 = vcmp.eq.f32.partialorder %v819_v46, 8.507059e+37 }
 0x195   :  { %v1161_v62 = vsel %vm1082_vm7, %v1637_v6, %v1129_v23  ;;  %v798_v56 = vmul.f32 %v1382_v2, %v797_v59 }
 0x196   :  { %1193 = vst [vmem:[%s2204_s5 + $0x60] sm:$0xff] %v1161_v62 }
 0x197   :  { %v1384_v55 = vpop.eup %1383  ;;  %v799_v60 = vadd.f32 %v1382_v2, %v798_v56 }
 0x198   :  { %v1386_v43 = vpop.eup %1385  ;;  %v583_v16 = vadd.f32 1.0, %v1384_v55 }
 0x199   :  { %v803_v13 = vsel %vm802_vm3, %v1382_v2, %v799_v60  ;;  %v811_v7 = vmul.f32 %v1386_v43, %v582_v61  ;;  %vm816_vm8 = vweird.f32 %v1386_v43 }
 0x19a   :  { %v808_v42 = vsel %vm805_vm6, %v807_v19, %v803_v13  ;;  %1387 = vrcp.f32 %v583_v16  ;;  %v432_v6 = vpop.f32.mrf.mxu2  ;;  %vm817_vm10 = vmor %vm815_vm9, %vm816_vm8  ;;  %v834_v36 = vand.u32 2147483647, %v583_v16  ;;  %v836_v55 = vand.u32 2147483648, %v583_v16 }
 0x19b   :  { %v1098_v63 = vsel %vm1084_vm5, %v808_v42, 0.0  ;;  %v812_v30 = vsub.f32 1.0, %v811_v7  ;;  %v433_v34 = vadd.f32 %v1669_v38, %v432_v6  ;;  %vm830_vm13 = vweird.f32 %v583_v16 }
 0x19c   :  { %v1130_v58 = vsel %vm1083_vm4, %v280_v14, %v1098_v63  ;;  %vm835_vm15 = vcmp.eq.f32.partialorder %v834_v36, 8.507059e+37 }
 0x19d   :  { %v1162_v2 = vsel %vm1082_vm7, %v1640_v12, %v1130_v58  ;;  %v813_v25 = vmul.f32 %v1386_v43, %v812_v30  ;;  %v1286_v1 = vmul.f32 -1.442695, %v433_v34 }
 0x19e   :  { %1194 = vst [vmem:[%s2204_s5 + $0x68] sm:$0xff] %v1162_v2 }
 0x19f   :  { %v814_v22 = vadd.f32 %v1386_v43, %v813_v25  ;;  %1389 = vpow2.f32 %v1286_v1 }
 0x1a0   :  { %v1388_v0 = vpop.eup %1387 }
 0x1a1   :  { %v818_v14 = vsel %vm817_vm10, %v1386_v43, %v814_v22  ;;  %v826_v59 = vmul.f32 %v1388_v0, %v583_v16  ;;  %vm831_vm12 = vweird.f32 %v1388_v0 }
 0x1a2   :  { %v823_v23 = vsel %vm820_vm11, %v822_v35, %v818_v14  ;;  %v434_v5 = vpop.f32.mrf.mxu2  ;;  %vm832_vm14 = vmor %vm830_vm13, %vm831_vm12 }
 0x1a3   :  { %v1099_v12 = vsel %vm1084_vm5, %v823_v23, 0.0  ;;  %v827_v62 = vsub.f32 1.0, %v826_v59  ;;  %v435_v56 = vadd.f32 %v1669_v38, %v434_v5 }
 0x1a4   :  { %v1131_v61 = vsel %vm1083_vm4, %v281_v26, %v1099_v12  ;;  %v837_v26 = vor.u32 1.1754944e-38, %v836_v55 }
 0x1a5   :  { %v1390_v60 = vpop.eup %1389  ;;  %v1163_v43 = vsel %vm1082_vm7, %v1649_v18, %v1131_v61  ;;  %v828_v19 = vmul.f32 %v1388_v0, %v827_v62  ;;  %v1287_v13 = vmul.f32 -1.442695, %v435_v56 }
 0x1a6   :  { %1195 = vst [vmem:[%s2204_s5 + $0x70] sm:$0xff] %v1163_v43  ;;  %v584_v7 = vadd.f32 1.0, %v1390_v60 }
 0x1a7   :  { %v829_v42 = vadd.f32 %v1388_v0, %v828_v19  ;;  %1391 = vpow2.f32 %v1287_v13 }
 0x1a8   :  { %1393 = vrcp.f32 %v584_v7  ;;  %vm845_vm1 = vweird.f32 %v584_v7 }
 0x1a9   :  { %v833_v6 = vsel %vm832_vm14, %v1388_v0, %v829_v42  ;;  %v851_v0 = vand.u32 2147483648, %v584_v7 }
 0x1aa   :  { %v838_v63 = vsel %vm835_vm15, %v837_v26, %v833_v6  ;;  %v437_v30 = vpop.f32.mrf.mxu2  ;;  %v2002_v6 = vld [vmem:[%s2203_s4] ss:$0 sm:$0xff] }
 0x1ab   :  { %v1100_v18 = vsel %vm1084_vm5, %v838_v63, 0.0  ;;  %v438_v34 = vadd.f32 %v1669_v38, %v437_v30  ;;  %v852_v62 = vor.u32 1.1754944e-38, %v851_v0 }
 0x1ac   :  { %v1132_v58 = vsel %vm1083_vm4, %v282_v27, %v1100_v18  ;;  %v849_v27 = vand.u32 2147483647, %v584_v7 }
 0x1ad   :  { %v1392_v46 = vpop.eup %1391  ;;  %v1164_v16 = vsel %vm1082_vm7, %v1652_v24, %v1132_v58  ;;  %v1288_v20 = vmul.f32 -1.442695, %v438_v34 }
 0x1ae   :  { %v1394_v2 = vpop.eup %1393  ;;  %1196 = vst [vmem:[%s2204_s5 + $0x78] sm:$0xff] %v1164_v16  ;;  %v585_v25 = vadd.f32 1.0, %v1392_v46  ;;  %vm850_vm3 = vcmp.eq.f32.partialorder %v849_v27, 8.507059e+37 }
 0x1af   :  { %v841_v1 = vmul.f32 %v1394_v2, %v584_v7  ;;  %1395 = vpow2.f32 %v1288_v20  ;;  %vm846_vm0 = vweird.f32 %v1394_v2 }
 0x1b0   :  { %1397 = vrcp.f32 %v585_v25  ;;  %vm847_vm2 = vmor %vm845_vm1, %vm846_vm0  ;;  %v864_v19 = vand.u32 2147483647, %v585_v25  ;;  %v866_v13 = vand.u32 2147483648, %v585_v25  ;;  %vm860_vm8 = vweird.f32 %v585_v25 }
 0x1b1   :  { %v842_v22 = vsub.f32 1.0, %v841_v1 }
 0x1b2   :  { %v439_v35 = vpop.f32.mrf.mxu2  ;;  %vm865_vm10 = vcmp.eq.f32.partialorder %v864_v19, 8.507059e+37 }
 0x1b3   :  { %v843_v14 = vmul.f32 %v1394_v2, %v842_v22  ;;  %v440_v59 = vadd.f32 %v1669_v38, %v439_v35 }
 0x1b5   :  { %v1396_v23 = vpop.eup %1395  ;;  %v844_v24 = vadd.f32 %v1394_v2, %v843_v14  ;;  %v1289_v5 = vmul.f32 -1.442695, %v440_v59 }
 0x1b6   :  { %v1398_v12 = vpop.eup %1397  ;;  %v586_v56 = vadd.f32 1.0, %v1396_v23 }
 0x1b7   :  { %v848_v61 = vsel %vm847_vm2, %v1394_v2, %v844_v24  ;;  %v856_v36 = vmul.f32 %v1398_v12, %v585_v25  ;;  %1399 = vpow2.f32 %v1289_v5  ;;  %vm861_vm6 = vweird.f32 %v1398_v12 }
 0x1b8   :  { %v853_v55 = vsel %vm850_vm3, %v852_v62, %v848_v61  ;;  %1401 = vrcp.f32 %v586_v56  ;;  %vm862_vm9 = vmor %vm860_vm8, %vm861_vm6  ;;  %v879_v22 = vand.u32 2147483647, %v586_v56  ;;  %v881_v0 = vand.u32 2147483648, %v586_v56 }
 0x1b9   :  { %v1101_v60 = vsel %vm1084_vm5, %v853_v55, 0.0  ;;  %v857_v43 = vsub.f32 1.0, %v856_v36  ;;  %vm875_vm12 = vweird.f32 %v586_v56 }
 0x1ba   :  { %v1133_v38 = vsel %vm1083_vm4, %v283_v39, %v1101_v60  ;;  %v442_v7 = vpop.f32.mrf.mxu2  ;;  %vm880_vm14 = vcmp.eq.f32.partialorder %v879_v22, 8.507059e+37 }
 0x1bb   :  { %v1165_v42 = vsel %vm1082_vm7, %v1661_v32, %v1133_v38  ;;  %v858_v26 = vmul.f32 %v1398_v12, %v857_v43  ;;  %v443_v63 = vadd.f32 %v2002_v6, %v442_v7  ;;  %v867_v32 = vor.u32 1.1754944e-38, %v866_v13 }
 0x1bc   :  { %1197 = vst [vmem:[%s2204_s5 + $0x80] sm:$0xff] %v1165_v42  ;;  %v2209_v43 = vmax.f32 %v1679_v51, 0.0 }
 0x1bd   :  { %v1400_v39 = vpop.eup %1399  ;;  %v859_v30 = vadd.f32 %v1398_v12, %v858_v26  ;;  %v1290_v18 = vmul.f32 -1.442695, %v443_v63 }
 0x1be   :  { %v1402_v34 = vpop.eup %1401  ;;  %v587_v58 = vadd.f32 1.0, %v1400_v39 }
 0x1bf   :  { %v863_v46 = vsel %vm862_vm9, %v1398_v12, %v859_v30  ;;  %v871_v16 = vmul.f32 %v1402_v34, %v586_v56  ;;  %1403 = vpow2.f32 %v1290_v18  ;;  %vm876_vm11 = vweird.f32 %v1402_v34 }
 0x1c0   :  { %v868_v20 = vsel %vm865_vm10, %v867_v32, %v863_v46  ;;  %1405 = vrcp.f32 %v587_v58  ;;  %vm877_vm13 = vmor %vm875_vm12, %vm876_vm11  ;;  %v882_v12 = vor.u32 1.1754944e-38, %v881_v0  ;;  %v894_v38 = vand.u32 2147483647, %v587_v58 }
 0x1c1   :  { %v1102_v2 = vsel %vm1084_vm5, %v868_v20, 0.0  ;;  %v872_v1 = vsub.f32 1.0, %v871_v16  ;;  %v896_v19 = vand.u32 2147483648, %v587_v58  ;;  %vm890_vm0 = vweird.f32 %v587_v58 }
 0x1c2   :  { %v1134_v25 = vsel %vm1083_vm4, %v284_v40, %v1102_v2  ;;  %v444_v35 = vpop.f32.mrf.mxu2  ;;  %vm895_vm2 = vcmp.eq.f32.partialorder %v894_v38, 8.507059e+37 }
 0x1c3   :  { %v1166_v14 = vsel %vm1082_vm7, %v1664_v37, %v1134_v25  ;;  %v873_v27 = vmul.f32 %v1402_v34, %v872_v1  ;;  %v445_v59 = vadd.f32 %v2002_v6, %v444_v35  ;;  %v2210_v1 = vmax.f32 %v1682_v52, 0.0 }
 0x1c4   :  { %1198 = vst [vmem:[%s2204_s5 + $0x88] sm:$0xff] %v1166_v14 }
 0x1c5   :  { %v1404_v23 = vpop.eup %1403  ;;  %v874_v24 = vadd.f32 %v1402_v34, %v873_v27  ;;  %v1291_v5 = vmul.f32 -1.442695, %v445_v59 }
 0x1c6   :  { %v1406_v40 = vpop.eup %1405  ;;  %v588_v62 = vadd.f32 1.0, %v1404_v23 }
 0x1c7   :  { %v878_v61 = vsel %vm877_vm13, %v1402_v34, %v874_v24  ;;  %v886_v36 = vmul.f32 %v1406_v40, %v587_v58  ;;  %1407 = vpow2.f32 %v1291_v5  ;;  %vm891_vm15 = vweird.f32 %v1406_v40 }
 0x1c8   :  { %v883_v37 = vsel %vm880_vm14, %v882_v12, %v878_v61  ;;  %1409 = vrcp.f32 %v588_v62  ;;  %vm892_vm1 = vmor %vm890_vm0, %vm891_vm15  ;;  %v897_v34 = vor.u32 1.1754944e-38, %v896_v19  ;;  %v909_v25 = vand.u32 2147483647, %v588_v62 }
 0x1c9   :  { %v1103_v55 = vsel %vm1084_vm5, %v883_v37, 0.0  ;;  %v887_v60 = vsub.f32 1.0, %v886_v36  ;;  %v911_v22 = vand.u32 2147483648, %v588_v62  ;;  %vm905_vm6 = vweird.f32 %v588_v62 }
 0x1ca   :  { %v1135_v56 = vsel %vm1083_vm4, %v2209_v43, %v1103_v55  ;;  %v447_v13 = vpop.f32.mrf.mxu2  ;;  %vm910_vm9 = vcmp.eq.f32.partialorder %v909_v25, 8.507059e+37 }
 0x1cb   :  { %v1167_v7 = vsel %vm1082_vm7, %v1679_v51, %v1135_v56  ;;  %v888_v42 = vmul.f32 %v1406_v40, %v887_v60  ;;  %v448_v26 = vadd.f32 %v2002_v6, %v447_v13  ;;  %v2211_v60 = vmax.f32 %v1697_v41, 0.0 }
 0x1cc   :  { %1199 = vst [vmem:[%s2204_s5 + $0x90] sm:$0xff] %v1167_v7 }
 0x1cd   :  { %v1408_v63 = vpop.eup %1407  ;;  %v889_v39 = vadd.f32 %v1406_v40, %v888_v42  ;;  %v1292_v30 = vmul.f32 -1.442695, %v448_v26 }
 0x1ce   :  { %v1410_v18 = vpop.eup %1409  ;;  %v589_v32 = vadd.f32 1.0, %v1408_v63 }
 0x1cf   :  { %v893_v46 = vsel %vm892_vm1, %v1406_v40, %v889_v39  ;;  %v901_v16 = vmul.f32 %v1410_v18, %v588_v62  ;;  %1411 = vpow2.f32 %v1292_v30  ;;  %vm906_vm3 = vweird.f32 %v1410_v18 }
 0x1d0   :  { %v898_v51 = vsel %vm895_vm2, %v897_v34, %v893_v46  ;;  %1413 = vrcp.f32 %v589_v32  ;;  %vm907_vm8 = vmor %vm905_vm6, %vm906_vm3  ;;  %v912_v40 = vor.u32 1.1754944e-38, %v911_v22  ;;  %v924_v43 = vand.u32 2147483647, %v589_v32 }
 0x1d1   :  { %v1104_v20 = vsel %vm1084_vm5, %v898_v51, 0.0  ;;  %v902_v2 = vsub.f32 1.0, %v901_v16  ;;  %v926_v56 = vand.u32 2147483648, %v589_v32  ;;  %vm920_vm11 = vweird.f32 %v589_v32 }
 0x1d2   :  { %v1136_v58 = vsel %vm1083_vm4, %v2210_v1, %v1104_v20  ;;  %v449_v0 = vpop.f32.mrf.mxu2  ;;  %vm925_vm13 = vcmp.eq.f32.partialorder %v924_v43, 8.507059e+37  ;;  %v2212_v20 = vmax.f32 %v1700_v44, 0.0 }
 0x1d3   :  { %v1168_v35 = vsel %vm1082_vm7, %v1682_v52, %v1136_v58  ;;  %v903_v14 = vmul.f32 %v1410_v18, %v902_v2  ;;  %v450_v27 = vadd.f32 %v2002_v6, %v449_v0  ;;  %v927_v30 = vor.u32 1.1754944e-38, %v926_v56 }
 0x1d4   :  { %1200 = vst [vmem:[%s2204_s5 + $0x98] sm:$0xff] %v1168_v35 }
 0x1d5   :  { %v1412_v59 = vpop.eup %1411  ;;  %v904_v23 = vadd.f32 %v1410_v18, %v903_v14  ;;  %v1293_v24 = vmul.f32 -1.442695, %v450_v27 }
 0x1d6   :  { %v1414_v5 = vpop.eup %1413  ;;  %v590_v12 = vadd.f32 1.0, %v1412_v59 }
 0x1d7   :  { %v908_v61 = vsel %vm907_vm8, %v1410_v18, %v904_v23  ;;  %v916_v36 = vmul.f32 %v1414_v5, %v589_v32  ;;  %1415 = vpow2.f32 %v1293_v24  ;;  %vm921_vm10 = vweird.f32 %v1414_v5 }
 0x1d8   :  { %v913_v52 = vsel %vm910_vm9, %v912_v40, %v908_v61  ;;  %1417 = vrcp.f32 %v590_v12  ;;  %vm922_vm12 = vmor %vm920_vm11, %vm921_vm10  ;;  %v939_v2 = vand.u32 2147483647, %v590_v12  ;;  %v941_v1 = vand.u32 2147483648, %v590_v12 }
 0x1d9   :  { %v1105_v37 = vsel %vm1084_vm5, %v913_v52, 0.0  ;;  %v917_v55 = vsub.f32 1.0, %v916_v36  ;;  %vm935_vm15 = vweird.f32 %v590_v12 }
 0x1da   :  { %v1137_v62 = vsel %vm1083_vm4, %v2211_v60, %v1105_v37  ;;  %v452_v38 = vpop.f32.mrf.mxu2  ;;  %v942_v23 = vor.u32 1.1754944e-38, %v941_v1  ;;  %vm940_vm1 = vcmp.eq.f32.partialorder %v939_v2, 8.507059e+37 }
 0x1db   :  { %v1169_v19 = vsel %vm1082_vm7, %v1697_v41, %v1137_v62  ;;  %v918_v13 = vmul.f32 %v1414_v5, %v917_v55  ;;  %v453_v7 = vadd.f32 %v2002_v6, %v452_v38 }
 0x1dc   :  { %1201 = vst [vmem:[%s2204_s5 + $0xa0] sm:$0xff] %v1169_v19 }
 0x1dd   :  { %v1416_v42 = vpop.eup %1415  ;;  %v919_v26 = vadd.f32 %v1414_v5, %v918_v13  ;;  %v1294_v63 = vmul.f32 -1.442695, %v453_v7 }
 0x1de   :  { %v1418_v39 = vpop.eup %1417  ;;  %v591_v18 = vadd.f32 1.0, %v1416_v42 }
 0x1df   :  { %v923_v34 = vsel %vm922_vm12, %v1414_v5, %v919_v26  ;;  %v931_v46 = vmul.f32 %v1418_v39, %v590_v12  ;;  %1419 = vpow2.f32 %v1294_v63  ;;  %vm936_vm14 = vweird.f32 %v1418_v39 }
 0x1e0   :  { %v928_v41 = vsel %vm925_vm13, %v927_v30, %v923_v34  ;;  %1421 = vrcp.f32 %v591_v18  ;;  %vm937_vm0 = vmor %vm935_vm15, %vm936_vm14  ;;  %v954_v52 = vand.u32 2147483647, %v591_v18  ;;  %v956_v37 = vand.u32 2147483648, %v591_v18 }
 0x1e1   :  { %v1106_v16 = vsel %vm1084_vm5, %v928_v41, 0.0  ;;  %v932_v51 = vsub.f32 1.0, %v931_v46  ;;  %vm950_vm3 = vweird.f32 %v591_v18 }
 0x1e2   :  { %v1138_v32 = vsel %vm1083_vm4, %v2212_v20, %v1106_v16  ;;  %v454_v58 = vpop.f32.mrf.mxu2  ;;  %v957_v13 = vor.u32 1.1754944e-38, %v956_v37  ;;  %vm955_vm8 = vcmp.eq.f32.partialorder %v954_v52, 8.507059e+37 }
 0x1e3   :  { %v1170_v25 = vsel %vm1082_vm7, %v1700_v44, %v1138_v32  ;;  %v933_v22 = vmul.f32 %v1418_v39, %v932_v51  ;;  %v455_v0 = vadd.f32 %v2002_v6, %v454_v58 }
 0x1e4   :  { %1202 = vst [vmem:[%s2204_s5 + $0xa8] sm:$0xff] %v1170_v25 }
 0x1e5   :  { %v1420_v35 = vpop.eup %1419  ;;  %v934_v14 = vadd.f32 %v1418_v39, %v933_v22  ;;  %v1295_v27 = vmul.f32 -1.442695, %v455_v0 }
 0x1e6   :  { %v1422_v59 = vpop.eup %1421  ;;  %v592_v24 = vadd.f32 1.0, %v1420_v35 }
 0x1e7   :  { %v938_v5 = vsel %vm937_vm0, %v1418_v39, %v934_v14  ;;  %v946_v40 = vmul.f32 %v1422_v59, %v591_v18  ;;  %1423 = vpow2.f32 %v1295_v27  ;;  %vm951_vm2 = vweird.f32 %v1422_v59 }
 0x1e8   :  { %v943_v44 = vsel %vm940_vm1, %v942_v23, %v938_v5  ;;  %1425 = vrcp.f32 %v592_v24  ;;  %vm952_vm6 = vmor %vm950_vm3, %vm951_vm2  ;;  %v969_v18 = vand.u32 2147483647, %v592_v24  ;;  %v971_v34 = vand.u32 2147483648, %v592_v24 }
 0x1e9   :  { %v1107_v61 = vsel %vm1084_vm5, %v943_v44, 0.0  ;;  %v947_v36 = vsub.f32 1.0, %v946_v40  ;;  %vm965_vm10 = vweird.f32 %v592_v24 }
 0x1ea   :  { %v1139_v12 = vsel %vm1083_vm4, %v289_v53, %v1107_v61  ;;  %v457_v55 = vpop.f32.mrf.mxu2  ;;  %v972_v1 = vor.u32 1.1754944e-38, %v971_v34  ;;  %vm970_vm12 = vcmp.eq.f32.partialorder %v969_v18, 8.507059e+37 }
 0x1eb   :  { %v1171_v60 = vsel %vm1082_vm7, %v1733_v17, %v1139_v12  ;;  %v948_v62 = vmul.f32 %v1422_v59, %v947_v36  ;;  %v458_v43 = vadd.f32 %v2002_v6, %v457_v55 }
 0x1ec   :  { %1203 = vst [vmem:[%s2204_s5 + $0xb0] sm:$0xff] %v1171_v60 }
 0x1ed   :  { %v1424_v56 = vpop.eup %1423  ;;  %v949_v38 = vadd.f32 %v1422_v59, %v948_v62  ;;  %v1296_v19 = vmul.f32 -1.442695, %v458_v43 }
 0x1ee   :  { %v1426_v53 = vpop.eup %1425  ;;  %v593_v7 = vadd.f32 1.0, %v1424_v56 }
 0x1ef   :  { %v953_v42 = vsel %vm952_vm6, %v1422_v59, %v949_v38  ;;  %v961_v26 = vmul.f32 %v1426_v53, %v592_v24  ;;  %1427 = vpow2.f32 %v1296_v19  ;;  %vm966_vm9 = vweird.f32 %v1426_v53 }
 0x1f0   :  { %v958_v17 = vsel %vm955_vm8, %v957_v13, %v953_v42  ;;  %1429 = vrcp.f32 %v593_v7  ;;  %vm967_vm11 = vmor %vm965_vm10, %vm966_vm9  ;;  %v984_v27 = vand.u32 2147483647, %v593_v7  ;;  %v986_v59 = vand.u32 2147483648, %v593_v7 }
 0x1f1   :  { %v1108_v63 = vsel %vm1084_vm5, %v958_v17, 0.0  ;;  %v962_v39 = vsub.f32 1.0, %v961_v26  ;;  %vm980_vm14 = vweird.f32 %v593_v7 }
 0x1f2   :  { %v1140_v30 = vsel %vm1083_vm4, %v290_v9, %v1108_v63  ;;  %v459_v46 = vpop.f32.mrf.mxu2  ;;  %v987_v12 = vor.u32 1.1754944e-38, %v986_v59  ;;  %vm985_vm0 = vcmp.eq.f32.partialorder %v984_v27, 8.507059e+37 }
 0x1f3   :  { %v1172_v41 = vsel %vm1082_vm7, %v1741_v15, %v1140_v30  ;;  %v963_v16 = vmul.f32 %v1426_v53, %v962_v39  ;;  %v460_v51 = vadd.f32 %v2002_v6, %v459_v46 }
 0x1f4   :  { %1204 = vst [vmem:[%s2204_s5 + $0xb8] sm:$0xff] %v1172_v41 }
 0x1f5   :  { %v1428_v20 = vpop.eup %1427  ;;  %v964_v32 = vadd.f32 %v1426_v53, %v963_v16  ;;  %v1297_v2 = vmul.f32 -1.442695, %v460_v51 }
 0x1f6   :  { %v1430_v9 = vpop.eup %1429  ;;  %v594_v58 = vadd.f32 1.0, %v1428_v20 }
 0x1f7   :  { %v968_v25 = vsel %vm967_vm11, %v1426_v53, %v964_v32  ;;  %v976_v22 = vmul.f32 %v1430_v9, %v593_v7  ;;  %1431 = vpow2.f32 %v1297_v2  ;;  %vm981_vm13 = vweird.f32 %v1430_v9 }
 0x1f8   :  { %v973_v15 = vsel %vm970_vm12, %v972_v1, %v968_v25  ;;  %1433 = vrcp.f32 %v594_v58  ;;  %vm982_vm15 = vmor %vm980_vm14, %vm981_vm13  ;;  %v999_v56 = vand.u32 2147483647, %v594_v58  ;;  %v1001_v38 = vand.u32 2147483648, %v594_v58 }
 0x1f9   :  { %v1109_v0 = vsel %vm1084_vm5, %v973_v15, 0.0  ;;  %v977_v35 = vsub.f32 1.0, %v976_v22  ;;  %vm995_vm2 = vweird.f32 %v594_v58 }
 0x1fa   :  { %v1141_v14 = vsel %vm1083_vm4, %v291_v49, %v1109_v0  ;;  %v462_v23 = vpop.f32.mrf.mxu2  ;;  %v1002_v63 = vor.u32 1.1754944e-38, %v1001_v38  ;;  %vm1000_vm6 = vcmp.eq.f32.partialorder %v999_v56, 8.507059e+37 }
 0x1fb   :  { %v1173_v24 = vsel %vm1082_vm7, %v1775_v8, %v1141_v14  ;;  %v978_v5 = vmul.f32 %v1430_v9, %v977_v35  ;;  %v463_v40 = vadd.f32 %v2002_v6, %v462_v23 }
 0x1fc   :  { %1205 = vst [vmem:[%s2204_s5 + $0xc0] sm:$0xff] %v1173_v24 }
 0x1fd   :  { %v1432_v44 = vpop.eup %1431  ;;  %v979_v61 = vadd.f32 %v1430_v9, %v978_v5  ;;  %v1298_v36 = vmul.f32 -1.442695, %v463_v40 }
 0x1fe   :  { %v1434_v49 = vpop.eup %1433  ;;  %v595_v52 = vadd.f32 1.0, %v1432_v44 }
 0x1ff   :  { %v983_v37 = vsel %vm982_vm15, %v1430_v9, %v979_v61  ;;  %v991_v55 = vmul.f32 %v1434_v49, %v594_v58  ;;  %1435 = vpow2.f32 %v1298_v36  ;;  %vm996_vm1 = vweird.f32 %v1434_v49 }
 0x200   :  { %v988_v8 = vsel %vm985_vm0, %v987_v12, %v983_v37  ;;  %1437 = vrcp.f32 %v595_v52  ;;  %vm997_vm3 = vmor %vm995_vm2, %vm996_vm1  ;;  %v1014_v16 = vand.u32 2147483647, %v595_v52  ;;  %v1016_v51 = vand.u32 2147483648, %v595_v52 }
 0x201   :  { %v1110_v60 = vsel %vm1084_vm5, %v988_v8, 0.0  ;;  %v992_v62 = vsub.f32 1.0, %v991_v55  ;;  %vm1010_vm9 = vweird.f32 %v595_v52 }
 0x202   :  { %v1142_v43 = vsel %vm1083_vm4, %v292_v21, %v1110_v60  ;;  %v464_v19 = vpop.f32.mrf.mxu2  ;;  %v1017_v22 = vor.u32 1.1754944e-38, %v1016_v51  ;;  %vm1015_vm11 = vcmp.eq.f32.partialorder %v1014_v16, 8.507059e+37 }
 0x203   :  { %v1174_v53 = vsel %vm1082_vm7, %v1782_v29, %v1142_v43  ;;  %v993_v13 = vmul.f32 %v1434_v49, %v992_v62  ;;  %v465_v7 = vadd.f32 %v2002_v6, %v464_v19 }
 0x204   :  { %1206 = vst [vmem:[%s2204_s5 + $0xc8] sm:$0xff] %v1174_v53 }
 0x205   :  { %v1436_v42 = vpop.eup %1435  ;;  %v994_v26 = vadd.f32 %v1434_v49, %v993_v13  ;;  %v1299_v17 = vmul.f32 -1.442695, %v465_v7 }
 0x206   :  { %v1438_v21 = vpop.eup %1437  ;;  %v596_v39 = vadd.f32 1.0, %v1436_v42 }
 0x207   :  { %v998_v30 = vsel %vm997_vm3, %v1434_v49, %v994_v26  ;;  %v1006_v18 = vmul.f32 %v1438_v21, %v595_v52  ;;  %1439 = vpow2.f32 %v1299_v17  ;;  %vm1011_vm8 = vweird.f32 %v1438_v21 }
 0x208   :  { %v1003_v29 = vsel %vm1000_vm6, %v1002_v63, %v998_v30  ;;  %1441 = vrcp.f32 %v596_v39  ;;  %vm1012_vm10 = vmor %vm1010_vm9, %vm1011_vm8  ;;  %v1029_v23 = vand.u32 2147483647, %v596_v39  ;;  %v1031_v24 = vand.u32 2147483648, %v596_v39 }
 0x209   :  { %v1111_v34 = vsel %vm1084_vm5, %v1003_v29, 0.0  ;;  %v1007_v46 = vsub.f32 1.0, %v1006_v18  ;;  %vm1025_vm13 = vweird.f32 %v596_v39 }
 0x20a   :  { %v1143_v41 = vsel %vm1083_vm4, %v293_v28, %v1111_v34  ;;  %v467_v20 = vpop.f32.mrf.mxu2  ;;  %v1032_v52 = vor.u32 1.1754944e-38, %v1031_v24  ;;  %vm1030_vm15 = vcmp.eq.f32.partialorder %v1029_v23, 8.507059e+37 }
 0x20b   :  { %v1175_v32 = vsel %vm1082_vm7, %v1814_v11, %v1143_v41  ;;  %v1008_v2 = vmul.f32 %v1438_v21, %v1007_v46  ;;  %v468_v9 = vadd.f32 %v2002_v6, %v467_v20 }
 0x20c   :  { %1207 = vst [vmem:[%s2204_s5 + $0xd0] sm:$0xff] %v1175_v32 }
 0x20d   :  { %v1440_v1 = vpop.eup %1439  ;;  %v1009_v58 = vadd.f32 %v1438_v21, %v1008_v2  ;;  %v1300_v25 = vmul.f32 -1.442695, %v468_v9 }
 0x20e   :  { %v1442_v28 = vpop.eup %1441  ;;  %v597_v15 = vadd.f32 1.0, %v1440_v1 }
 0x20f   :  { %v1013_v0 = vsel %vm1012_vm10, %v1438_v21, %v1009_v58  ;;  %v1021_v35 = vmul.f32 %v1442_v28, %v596_v39  ;;  %1443 = vpow2.f32 %v1300_v25  ;;  %vm1026_vm12 = vweird.f32 %v1442_v28 }
 0x210   :  { %v1018_v11 = vsel %vm1015_vm11, %v1017_v22, %v1013_v0  ;;  %1445 = vrcp.f32 %v597_v15  ;;  %vm1027_vm14 = vmor %vm1025_vm13, %vm1026_vm12  ;;  %v1046_v43 = vand.u32 2147483648, %v597_v15  ;;  %v1044_v19 = vand.u32 2147483647, %v597_v15 }
 0x211   :  { %v1112_v14 = vsel %vm1084_vm5, %v1018_v11, 0.0  ;;  %v1022_v27 = vsub.f32 1.0, %v1021_v35  ;;  %vm1040_vm1 = vweird.f32 %v597_v15 }
 0x212   :  { %v1144_v59 = vsel %vm1083_vm4, %v294_v33, %v1112_v14  ;;  %v469_v5 = vpop.f32.mrf.mxu2  ;;  %v1047_v42 = vor.u32 1.1754944e-38, %v1046_v43  ;;  %vm1045_vm3 = vcmp.eq.f32.partialorder %v1044_v19, 8.507059e+37 }
 0x213   :  { %v1176_v40 = vsel %vm1082_vm7, %v1821_v54, %v1144_v59  ;;  %v1023_v44 = vmul.f32 %v1442_v28, %v1022_v27  ;;  %v470_v61 = vadd.f32 %v2002_v6, %v469_v5 }
 0x214   :  { %1208 = vst [vmem:[%s2204_s5 + $0xd8] sm:$0xff] %v1176_v40 }
 0x215   :  { %v1444_v36 = vpop.eup %1443  ;;  %v1024_v49 = vadd.f32 %v1442_v28, %v1023_v44  ;;  %v1301_v12 = vmul.f32 -1.442695, %v470_v61 }
 0x216   :  { %v1446_v33 = vpop.eup %1445  ;;  %v598_v37 = vadd.f32 1.0, %v1444_v36 }
 0x217   :  { %v1028_v55 = vsel %vm1027_vm14, %v1442_v28, %v1024_v49  ;;  %v1036_v8 = vmul.f32 %v1446_v33, %v597_v15  ;;  %1447 = vpow2.f32 %v1301_v12  ;;  %vm1041_vm0 = vweird.f32 %v1446_v33 }
 0x218   :  { %v1033_v54 = vsel %vm1030_vm15, %v1032_v52, %v1028_v55  ;;  %1449 = vrcp.f32 %v598_v37  ;;  %vm1042_vm2 = vmor %vm1040_vm1, %vm1041_vm0  ;;  %v1061_v30 = vand.u32 2147483648, %v598_v37  ;;  %v1059_v34 = vand.u32 2147483647, %v598_v37 }
 0x219   :  { %v1113_v6 = vsel %vm1084_vm5, %v1033_v54, 0.0  ;;  %v1037_v60 = vsub.f32 1.0, %v1036_v8  ;;  %vm1055_vm8 = vweird.f32 %v598_v37 }
 0x21a   :  { %v1145_v62 = vsel %vm1083_vm4, %v295_v31, %v1113_v6  ;;  %v1062_v16 = vor.u32 1.1754944e-38, %v1061_v30  ;;  %vm1060_vm10 = vcmp.eq.f32.partialorder %v1059_v34, 8.507059e+37 }
 0x21b   :  { %v1177_v56 = vsel %vm1082_vm7, %v1852_v4, %v1145_v62  ;;  %v1038_v38 = vmul.f32 %v1446_v33, %v1037_v60 }
 0x21c   :  { %1209 = vst [vmem:[%s2204_s5 + $0xe0] sm:$0xff] %v1177_v56 }
 0x21d   :  { %v1448_v53 = vpop.eup %1447  ;;  %v1039_v13 = vadd.f32 %v1446_v33, %v1038_v38 }
 0x21e   :  { %v1450_v7 = vpop.eup %1449  ;;  %v599_v26 = vadd.f32 1.0, %v1448_v53 }
 0x21f   :  { %v1043_v31 = vsel %vm1042_vm2, %v1446_v33, %v1039_v13  ;;  %v1051_v17 = vmul.f32 %v1450_v7, %v598_v37  ;;  %vm1056_vm6 = vweird.f32 %v1450_v7 }
 0x220   :  { %v1048_v21 = vsel %vm1045_vm3, %v1047_v42, %v1043_v31  ;;  %1451 = vrcp.f32 %v599_v26  ;;  %vm1057_vm9 = vmor %vm1055_vm8, %vm1056_vm6  ;;  %v1076_v9 = vand.u32 2147483648, %v599_v26  ;;  %v1074_v25 = vand.u32 2147483647, %v599_v26 }
 0x221   :  { %v1114_v4 = vsel %vm1084_vm5, %v1048_v21, 0.0  ;;  %v1052_v63 = vsub.f32 1.0, %v1051_v17  ;;  %vm1070_vm12 = vweird.f32 %v599_v26 }
 0x222   :  { %v1146_v39 = vsel %vm1083_vm4, %v296_v45, %v1114_v4  ;;  %v1077_v22 = vor.u32 1.1754944e-38, %v1076_v9  ;;  %vm1075_vm14 = vcmp.eq.f32.partialorder %v1074_v25, 8.507059e+37 }
 0x223   :  { %v1178_v18 = vsel %vm1082_vm7, %v1859_v48, %v1146_v39  ;;  %v1053_v29 = vmul.f32 %v1450_v7, %v1052_v63 }
 0x224   :  { %1210 = vst [vmem:[%s2204_s5 + $0xe8] sm:$0xff] %v1178_v18 }
 0x225   :  { %v1054_v46 = vadd.f32 %v1450_v7, %v1053_v29 }
 0x226   :  { %v1452_v41 = vpop.eup %1451 }
 0x227   :  { %v1058_v51 = vsel %vm1057_vm9, %v1450_v7, %v1054_v46  ;;  %v1066_v45 = vmul.f32 %v1452_v41, %v599_v26  ;;  %vm1071_vm11 = vweird.f32 %v1452_v41 }
 0x228   :  { %v1063_v20 = vsel %vm1060_vm10, %v1062_v16, %v1058_v51  ;;  %vm1072_vm13 = vmor %vm1070_vm12, %vm1071_vm11 }
 0x229   :  { %v1115_v32 = vsel %vm1084_vm5, %v1063_v20, 0.0  ;;  %v1067_v48 = vsub.f32 1.0, %v1066_v45 }
 0x22a   :  { %v1147_v2 = vsel %vm1083_vm4, %v297_v47, %v1115_v32 }
 0x22b   :  { %v1179_v1 = vsel %vm1082_vm7, %v1890_v10, %v1147_v2  ;;  %v1068_v58 = vmul.f32 %v1452_v41, %v1067_v48 }
 0x22c   :  { %1211 = vst [vmem:[%s2204_s5 + $0xf0] sm:$0xff] %v1179_v1 }
 0x22d   :  { %v1069_v28 = vadd.f32 %v1452_v41, %v1068_v58 }
 0x22f   :  { %v1073_v15 = vsel %vm1072_vm13, %v1452_v41, %v1069_v28 }
 0x230   :  { %v1078_v0 = vsel %vm1075_vm14, %v1077_v22, %v1073_v15 }
 0x231   :  { %v1116_v47 = vsel %vm1084_vm5, %v1078_v0, 0.0 }
 0x232   :  { %v1148_v10 = vsel %vm1083_vm4, %v298_v57, %v1116_v47 }
 0x233   :  { %v1180_v35 = vsel %vm1082_vm7, %v1897_v3, %v1148_v10 }
 0x234   :  { %1212 = vst [vmem:[%s2204_s5 + $0xf8] sm:$0xff] %v1180_v35 }
 0x235   :  { %1217 = vsyncpa [#allocation3], 1 }

// kernel: squeeze.7
= control target key start
LH: loop header
LB: loop body
LE: loop exit
PB: predicated region body
PF: predicated region fallthrough
CT: control target
= control target key end

     0   :  { %s202_s0 = inlined_call_operand.vmem [shape: f32[256], index: 0, kind: input, shape index: {}]   ;;  %s203_s1 = inlined_call_operand.hbm [shape: f32[4,8,8], index: 1, kind: output, shape index: {}]  }
   0x1   :  { %v5_v0 = vld [vmem:[%s202_s0] sm:$0x3] }
   0x2   :  { %2 = vsyncpa [#allocation1], 0  ;;  %6 = vst [vmem:[#allocation2] sm:$0x3] %v5_v0  ;;  %s154_s0 = smov 104   ;;  %s155_s8 = smov 120  }
   0x3   :  { %s156_s9 = smov 88   ;;  %s157_s10 = smov 96   ;;  %vm8_vm0 = vcmask 64512  }
   0x4   :  { %s158_s11 = smov 112   ;;  %s159_s12 = smov 80  }
   0x5   :  { %s160_s13 = smov 64   ;;  %s161_s14 = smov 72  }
   0x6   :  { %s162_s15 = smov 56   ;;  %s163_s16 = smov 40  }
   0x7   :  { %s164_s17 = smov 48   ;;  %s165_s18 = smov 32  }
   0x8   :  { %s166_s19 = smov 16   ;;  %s167_s20 = smov 24  }
   0x9   :  { %v22_v1 = vld [vmem:[#allocation2] sm:$0x3]   ;;  %s168_s21 = smov 8   ;;  %s169_s22 = smov [#allocation0]  }
   0xa   :  { %v10_v2 = vld [vmem:[#allocation2] sm:$0x3]   ;;  %23 = vrot.lane.b32.xlu1 %v22_v1, %s154_s0  ;;  %s103_s23 = sshll.u32 %s169_s22, 4  ;;  %s105_s1 = sshll.u32 %s203_s1, 4  ;;  %s104_s23 = int_to_ptr.vmem [resolvable:$true] %s103_s23  ;;  %s106_s1 = int_to_ptr.hbm [resolvable:$true] %s105_s1 }
   0xb   :  { %11 = vrot.lane.b32.xlu0 %v10_v2, %s155_s8  ;;  %v34_v3 = vld [vmem:[#allocation2] sm:$0x3]  }
   0xc   :  { %35 = vrot.lane.b32.xlu2 %v34_v3, %s156_s9  ;;  %v28_v4 = vld [vmem:[#allocation2] sm:$0x3]  }
   0xd   :  { %v16_v5 = vld [vmem:[#allocation2] sm:$0x3]  }
   0xe   :  { %v40_v6 = vld [vmem:[#allocation2] sm:$0x3]  }
   0xf   :  { %v52_v7 = vld [vmem:[#allocation2] sm:$0x3]  }
  0x10   :  { %v46_v8 = vld [vmem:[#allocation2] sm:$0x3]  }
  0x11   :  { %v58_v9 = vld [vmem:[#allocation2] sm:$0x3]  }
  0x12   :  { %29 = vrot.lane.b32.xlu1 %v28_v4, %s157_s10  ;;  %v70_v10 = vld [vmem:[#allocation2] sm:$0x3]  }
  0x13   :  { %17 = vrot.lane.b32.xlu0 %v16_v5, %s158_s11  ;;  %v64_v11 = vld [vmem:[#allocation2] sm:$0x3]  }
  0x14   :  { %41 = vrot.lane.b32.xlu2 %v40_v6, %s159_s12  ;;  %v76_v12 = vld [vmem:[#allocation2] sm:$0x3]  }
  0x15   :  { %v88_v13 = vld [vmem:[#allocation2] sm:$0x3]  }
  0x16   :  { %v82_v14 = vld [vmem:[#allocation2] sm:$0x3]  }
  0x17   :  { %v94_v15 = vld [vmem:[#allocation2] sm:$0x3]  }
  0x18   :  { %v7_v21 = vld [vmem:[#allocation2] sm:$0x3]  }
  0x19   :  { %9 = vst.msk [vmem:[#allocation0] ss:$16 sm:$0x3] %vm8_vm0, %v7_v21  }
  0x1a   :  { %53 = vrot.lane.b32.xlu1 %v52_v7, %s160_s13 }
  0x1b   :  { %47 = vrot.lane.b32.xlu0 %v46_v8, %s161_s14 }
  0x1c   :  { %59 = vrot.lane.b32.xlu2 %v58_v9, %s162_s15 }
  0x22   :  { %71 = vrot.lane.b32.xlu1 %v70_v10, %s163_s16 }
  0x23   :  { %65 = vrot.lane.b32.xlu0 %v64_v11, %s164_s17 }
  0x24   :  { %77 = vrot.lane.b32.xlu2 %v76_v12, %s165_s18 }
  0x2a   :  { %89 = vrot.lane.b32.xlu1 %v88_v13, %s166_s19 }
  0x2b   :  { %83 = vrot.lane.b32.xlu0 %v82_v14, %s167_s20 }
  0x2c   :  { %95 = vrot.lane.b32.xlu2 %v94_v15, %s168_s21 }
  0x66   :  { %v36_v16 = vpop.permute.xlu2 %35  }
  0x67   :  { %39 = vst.msk [vmem:[#allocation0 + $0x5] ss:$16 sm:$0x3] %vm8_vm0, %v36_v16  }
  0x6e   :  { %v42_v17 = vpop.permute.xlu2 %41  }
  0x6f   :  { %45 = vst.msk [vmem:[#allocation0 + $0x6] ss:$16 sm:$0x3] %vm8_vm0, %v42_v17  }
  0x76   :  { %v60_v18 = vpop.permute.xlu2 %59  }
  0x77   :  { %63 = vst.msk [vmem:[#allocation0 + $0x9] ss:$16 sm:$0x3] %vm8_vm0, %v60_v18  }
  0x7c   :  { %v24_v19 = vpop.permute.xlu1 %23  }
  0x7d   :  { %v12_v20 = vpop.permute.xlu0 %11   ;;  %27 = vst.msk [vmem:[#allocation0 + $0x3] ss:$16 sm:$0x3] %vm8_vm0, %v24_v19  }
  0x7e   :  { %15 = vst.msk [vmem:[#allocation0 + $0x1] ss:$16 sm:$0x3] %vm8_vm0, %v12_v20   ;;  %v78_v22 = vpop.permute.xlu2 %77  }
  0x7f   :  { %81 = vst.msk [vmem:[#allocation0 + $0xc] ss:$16 sm:$0x3] %vm8_vm0, %v78_v22  }
  0x84   :  { %v30_v23 = vpop.permute.xlu1 %29  }
  0x85   :  { %v18_v24 = vpop.permute.xlu0 %17   ;;  %33 = vst.msk [vmem:[#allocation0 + $0x4] ss:$16 sm:$0x3] %vm8_vm0, %v30_v23  }
  0x86   :  { %21 = vst.msk [vmem:[#allocation0 + $0x2] ss:$16 sm:$0x3] %vm8_vm0, %v18_v24   ;;  %v96_v25 = vpop.permute.xlu2 %95  }
  0x87   :  { %99 = vst.msk [vmem:[#allocation0 + $0xf] ss:$16 sm:$0x3] %vm8_vm0, %v96_v25  }
  0x8c   :  { %v54_v26 = vpop.permute.xlu1 %53  }
  0x8d   :  { %v48_v27 = vpop.permute.xlu0 %47   ;;  %57 = vst.msk [vmem:[#allocation0 + $0x8] ss:$16 sm:$0x3] %vm8_vm0, %v54_v26  }
  0x8e   :  { %51 = vst.msk [vmem:[#allocation0 + $0x7] ss:$16 sm:$0x3] %vm8_vm0, %v48_v27  }
  0x94   :  { %v72_v28 = vpop.permute.xlu1 %71  }
  0x95   :  { %v66_v29 = vpop.permute.xlu0 %65   ;;  %75 = vst.msk [vmem:[#allocation0 + $0xb] ss:$16 sm:$0x3] %vm8_vm0, %v72_v28  }
  0x96   :  { %69 = vst.msk [vmem:[#allocation0 + $0xa] ss:$16 sm:$0x3] %vm8_vm0, %v66_v29  }
  0x9c   :  { %v90_v30 = vpop.permute.xlu1 %89  }
  0x9d   :  { %v84_v31 = vpop.permute.xlu0 %83   ;;  %93 = vst.msk [vmem:[#allocation0 + $0xe] ss:$16 sm:$0x3] %vm8_vm0, %v90_v30  }
  0x9e   :  { %87 = vst.msk [vmem:[#allocation0 + $0xd] ss:$16 sm:$0x3] %vm8_vm0, %v84_v31  }
  0x9f   :  { %108 = dma.vmem_to_hbm [thread:$0]  %s104_s23, 512, %s106_s1, [#allocation1]  }
  0xa0   :  { %152 = dma.done.wait [#allocation1], 512  }
  0xa1   :  { %153 = vsyncadd [#allocation1], 4294966784 }
  0xa2   :  { %111 = vsyncpa [#allocation1], 1 }

</bundles_post_ra>
